<compile_context>
chip_gen: v6e
topology: v6e:2x2x1
jax: 0.10.0
libtpu: 0.0.40
codegen_flags: <defaults>
</compile_context>

<pallas_src>
import jax
import jax.numpy as jnp
from jax.experimental import pallas as pl
from jax.experimental.pallas import tpu as pltpu

EPSILON = 1e-06


def _round_up(x, m):
    return (x + m - 1) // m * m


def _rye_gru_kernel(xc_ref, yi_ref, yh_ref, wyi_ref, wyh_ref, biy_ref, bhy_ref,
                    wxl_ref, wxr_ref, wxn_ref, nx_ref, y_ref):
    d_dim = xc_ref.shape[0]          # spatial dim D (small, unrolled)
    h = y_ref.shape[-1]              # hidden size

    yi = yi_ref[...]                 # (tile_b, I)
    yh = yh_ref[...]                 # (tile_b, H)

    # Fused y-path linears; columns are laid out as [r | z | n].
    giy = jnp.dot(yi, wyi_ref[...], preferred_element_type=jnp.float32) + biy_ref[...]
    ghy = jnp.dot(yh, wyh_ref[...], preferred_element_type=jnp.float32) + bhy_ref[...]

    # DotProductProjection (x1 is None -> x1 == x0): per-channel squared norm
    # over the spatial axis D.
    norm = xc_ref[0] * xc_ref[0]
    for d in range(1, d_dim):
        norm = norm + xc_ref[d] * xc_ref[d]
    inv_norm = 1.0 / (norm + EPSILON)                        # (tile_b, 1+C)

    # sum_d (x0n @ W_left) * (x0n @ W_right), fused for the r and z gates.
    xrz = jnp.zeros((yi.shape[0], 2 * h), jnp.float32)       # [xr | xz]
    for d in range(d_dim):
        x0n = xc_ref[d] * inv_norm                           # (tile_b, 1+C)
        left = jnp.dot(x0n, wxl_ref[...], preferred_element_type=jnp.float32)
        right = jnp.dot(x0n, wxr_ref[...], preferred_element_type=jnp.float32)
        xrz = xrz + left * right

    rz = jax.nn.sigmoid(giy[:, :2 * h] + ghy[:, :2 * h] + xrz)
    r = rz[:, :h]
    z = rz[:, h:]
    ny = jnp.tanh(giy[:, 2 * h:] + r * ghy[:, 2 * h:])

    # Damping: per-row scalar = ny @ w_xn; do it as a lane reduce (XLU), not an
    # N=1 MXU matmul.
    damp = jnp.sum(ny * wxn_ref[...], axis=-1, keepdims=True)   # (tile_b, 1)
    for d in range(d_dim):
        nx_ref[d] = (xc_ref[d] * damp).astype(nx_ref.dtype)

    y_ref[...] = ((1.0 - z) * ny + z * yh).astype(y_ref.dtype)


def rye_gru(xi, yi, xh, yh, params, *, tile_b=256):
    """xi: (B, D), yi: (B, I), xh: (B, D, C), yh: (B, H) -> (nx, y)."""
    b, d_dim, c = xh.shape
    cp = c + 1
    i_dim = yi.shape[-1]
    h = yh.shape[-1]

    # Pack weights in math layout (in, out).  Gate order is [r | z | n].
    w_yi = jnp.concatenate([params["w_ir"], params["w_iz"], params["w_in"]], axis=1)
    w_yh = jnp.concatenate([params["w_hr"], params["w_hz"], params["w_hn"]], axis=1)
    b_iy = jnp.concatenate([params["b_ir"], params["b_iz"], params["b_in"]]).reshape(1, 3 * h)
    b_hy = jnp.concatenate([params["b_hr"], params["b_hz"], params["b_hn"]]).reshape(1, 3 * h)
    w_xl = jnp.concatenate([params["w_xr_l"], params["w_xz_l"]], axis=1)   # (1+C, 2H)
    w_xr = jnp.concatenate([params["w_xr_r"], params["w_xz_r"]], axis=1)   # (1+C, 2H)
    w_xn = params["w_xn"].reshape(1, h)                                    # Damping fc

    # x_combined with the tiny spatial axis leading: (D, B, 1+C).
    xc = jnp.concatenate([xi[..., None], xh], axis=-1)       # (B, D, 1+C)
    xc_t = jnp.transpose(xc, (1, 0, 2))                      # (D, B, 1+C)

    # Batch tiling; pad B so every tile is full.  Padded zero rows are benign
    # (their norm is exactly EPSILON, so no division hazard).
    tile_b = _round_up(max(8, min(tile_b, _round_up(b, 8))), 8)
    b_pad = _round_up(b, tile_b)
    if b_pad != b:
        pad = b_pad - b
        yi = jnp.pad(yi, ((0, pad), (0, 0)))
        yh = jnp.pad(yh, ((0, pad), (0, 0)))
        xc_t = jnp.pad(xc_t, ((0, 0), (0, pad), (0, 0)))

    grid = (b_pad // tile_b,)

    # Advisory cost estimate for XLA's scheduler.
    flops = (2 * b_pad * (i_dim + h) * 3 * h            # fused y-path matmuls
             + 4 * b_pad * d_dim * cp * 2 * h           # DPP matmuls
             + 2 * b_pad * h                            # damping reduce
             + 12 * b_pad * h)                          # elementwise gate math
    transcendentals = 3 * b_pad * h
    bytes_accessed = 4 * (b_pad * (i_dim + 2 * h + 2 * d_dim * cp)
                          + (i_dim + h) * 3 * h + 4 * cp * h + 7 * h)

    # NOTE: for very large H / tile_b raise vmem_limit_bytes via CompilerParams
    # (defaults: 16 MiB scoped on v5e, 32 MiB on v6e/v7x).
    nx_t, y = pl.pallas_call(
        _rye_gru_kernel,
        out_shape=(
            jax.ShapeDtypeStruct((d_dim, b_pad, cp), xh.dtype),
            jax.ShapeDtypeStruct((b_pad, h), yh.dtype),
        ),
        grid_spec=pltpu.PrefetchScalarGridSpec(
            num_scalar_prefetch=0,
            grid=grid,
            in_specs=[
                pl.BlockSpec((d_dim, tile_b, cp), lambda ib: (0, ib, 0)),   # x_combined
                pl.BlockSpec((tile_b, i_dim), lambda ib: (ib, 0)),          # yi
                pl.BlockSpec((tile_b, h), lambda ib: (ib, 0)),              # yh
                pl.BlockSpec((i_dim, 3 * h), lambda ib: (0, 0)),            # W_yi [r|z|n]
                pl.BlockSpec((h, 3 * h), lambda ib: (0, 0)),                # W_yh [r|z|n]
                pl.BlockSpec((1, 3 * h), lambda ib: (0, 0)),                # b_i  [r|z|n]
                pl.BlockSpec((1, 3 * h), lambda ib: (0, 0)),                # b_h  [r|z|n]
                pl.BlockSpec((cp, 2 * h), lambda ib: (0, 0)),               # W_x left  [r|z]
                pl.BlockSpec((cp, 2 * h), lambda ib: (0, 0)),               # W_x right [r|z]
                pl.BlockSpec((1, h), lambda ib: (0, 0)),                    # Damping weight
            ],
            out_specs=[
                pl.BlockSpec((d_dim, tile_b, cp), lambda ib: (0, ib, 0)),   # nx (D-leading)
                pl.BlockSpec((tile_b, h), lambda ib: (ib, 0)),              # y
            ],
        ),
        compiler_params=pltpu.CompilerParams(dimension_semantics=("parallel",)),
        cost_estimate=pl.CostEstimate(flops=flops,
                                      transcendentals=transcendentals,
                                      bytes_accessed=bytes_accessed),
    )(xc_t, yi, yh, w_yi, w_yh, b_iy, b_hy, w_xl, w_xr, w_xn)

    nx = jnp.transpose(nx_t[:, :b, :], (1, 0, 2))            # (B, D, 1+C)
    if nx.shape[-1] == 1:   # torch .squeeze(-1) only fires when 1 + C == 1
        nx = nx[..., 0]
    return nx, y[:b]


def init_params(key, input_size, hidden_size, num_channels):
    """Deterministic torch-Linear-style init; weights stored as (in, out)."""
    cp = 1 + num_channels
    ks = jax.random.split(key, 17)

    def w(k, fan_in, fan_out):
        bound = 1.0 / (fan_in ** 0.5)
        return jax.random.uniform(k, (fan_in, fan_out), jnp.float32, -bound, bound)

    def bvec(k, fan_in, fan_out):
        bound = 1.0 / (fan_in ** 0.5)
        return jax.random.uniform(k, (fan_out,), jnp.float32, -bound, bound)

    return {
        "w_ir": w(ks[0], input_size, hidden_size),  "b_ir": bvec(ks[1], input_size, hidden_size),
        "w_hr": w(ks[2], hidden_size, hidden_size), "b_hr": bvec(ks[3], hidden_size, hidden_size),
        "w_iz": w(ks[4], input_size, hidden_size),  "b_iz": bvec(ks[5], input_size, hidden_size),
        "w_hz": w(ks[6], hidden_size, hidden_size), "b_hz": bvec(ks[7], hidden_size, hidden_size),
        "w_in": w(ks[8], input_size, hidden_size),  "b_in": bvec(ks[9], input_size, hidden_size),
        "w_hn": w(ks[10], hidden_size, hidden_size), "b_hn": bvec(ks[11], hidden_size, hidden_size),
        "w_xr_l": w(ks[12], cp, hidden_size), "w_xr_r": w(ks[13], cp, hidden_size),
        "w_xz_l": w(ks[14], cp, hidden_size), "w_xz_r": w(ks[15], cp, hidden_size),
        "w_xn": w(ks[16], hidden_size, 1),
    }


def rye_gru_reference(xi, yi, xh, yh, p):
    """Pure-JAX reference matching the PyTorch module's forward."""
    xc = jnp.concatenate([xi[..., None], xh], axis=-1)        # (B, D, 1+C)

    def dpp(x, wl, wr):
        norm = jnp.sum(x * x, axis=-2, keepdims=True) + EPSILON
        xn = x / norm
        return jnp.sum(jnp.matmul(xn, wl) * jnp.matmul(xn, wr), axis=-2)

    r = jax.nn.sigmoid(yi @ p["w_ir"] + p["b_ir"] + yh @ p["w_hr"] + p["b_hr"]
                       + dpp(xc, p["w_xr_l"], p["w_xr_r"]))
    z = jax.nn.sigmoid(yi @ p["w_iz"] + p["b_iz"] + yh @ p["w_hz"] + p["b_hz"]
                       + dpp(xc, p["w_xz_l"], p["w_xz_r"]))
    ny = jnp.tanh(yi @ p["w_in"] + p["b_in"] + r * (yh @ p["w_hn"] + p["b_hn"]))
    damp = ny @ p["w_xn"]                                     # (B, 1)
    nx = xc * damp[..., None, :]                              # (B, D, 1+C)
    if nx.shape[-1] == 1:
        nx = nx[..., 0]
    y = (1.0 - z) * ny + z * yh
    return nx, y


if __name__ == "__main__":
    key = jax.random.PRNGKey(0)
    B, D, C = 64, 3, 4            # batch, spatial dim, num_channels
    INPUT, HIDDEN = 128, 128      # input_size, hidden_size (lane-dense)

    k_xi, k_yi, k_xh, k_yh, k_p = jax.random.split(key, 5)
    xi = jax.random.normal(k_xi, (B, D), jnp.float32)
    yi = jax.random.normal(k_yi, (B, INPUT), jnp.float32)
    xh = jax.random.normal(k_xh, (B, D, C), jnp.float32)
    yh = jax.random.normal(k_yh, (B, HIDDEN), jnp.float32)
    params = init_params(k_p, INPUT, HIDDEN, C)

    run = jax.jit(rye_gru)
    nx, y = run(xi, yi, xh, yh, params)
    nx, y = jax.block_until_ready((nx, y))

    nx_ref, y_ref = rye_gru_reference(xi, yi, xh, yh, params)
    assert nx.shape == (B, D, C + 1) and y.shape == (B, HIDDEN)
    assert jnp.allclose(nx, nx_ref, atol=2e-3, rtol=2e-3)
    assert jnp.allclose(y, y_ref, atol=2e-3, rtol=2e-3)

    print("KERNEL_OK")
</pallas_src>

<mosaic_0001>
module attributes {stable_mosaic.version = 11 : i64} {
  func.func @_rye_gru_kernel(%arg0: i32, %arg1: memref<3x64x5xf32, #tpu.memory_space<vmem>>, %arg2: memref<64x128xf32, #tpu.memory_space<vmem>>, %arg3: memref<64x128xf32, #tpu.memory_space<vmem>>, %arg4: memref<128x384xf32, #tpu.memory_space<vmem>>, %arg5: memref<128x384xf32, #tpu.memory_space<vmem>>, %arg6: memref<1x384xf32, #tpu.memory_space<vmem>>, %arg7: memref<1x384xf32, #tpu.memory_space<vmem>>, %arg8: memref<5x256xf32, #tpu.memory_space<vmem>>, %arg9: memref<5x256xf32, #tpu.memory_space<vmem>>, %arg10: memref<1x128xf32, #tpu.memory_space<vmem>>, %arg11: memref<3x64x5xf32, #tpu.memory_space<vmem>>, %arg12: memref<64x128xf32, #tpu.memory_space<vmem>>) attributes {dimension_semantics = [#tpu.dimension_semantics<parallel>], iteration_bounds = array<i64: 1>, scalar_prefetch = 0 : i64, scratch_operands = 0 : i64, tpu.core_type = #tpu.core_type<tc>, window_params = [{transform_indices = @transform_0, window_bounds = array<i64: 3, 64, 5>}, {transform_indices = @transform_1, window_bounds = array<i64: 64, 128>}, {transform_indices = @transform_2, window_bounds = array<i64: 64, 128>}, {pipeline_mode = #tpu.pipeline_mode<synchronous>, transform_indices = @transform_3, window_bounds = array<i64: 128, 384>}, {pipeline_mode = #tpu.pipeline_mode<synchronous>, transform_indices = @transform_4, window_bounds = array<i64: 128, 384>}, {pipeline_mode = #tpu.pipeline_mode<synchronous>, transform_indices = @transform_5, window_bounds = array<i64: 1, 384>}, {pipeline_mode = #tpu.pipeline_mode<synchronous>, transform_indices = @transform_6, window_bounds = array<i64: 1, 384>}, {pipeline_mode = #tpu.pipeline_mode<synchronous>, transform_indices = @transform_7, window_bounds = array<i64: 5, 256>}, {pipeline_mode = #tpu.pipeline_mode<synchronous>, transform_indices = @transform_8, window_bounds = array<i64: 5, 256>}, {pipeline_mode = #tpu.pipeline_mode<synchronous>, transform_indices = @transform_9, window_bounds = array<i64: 1, 128>}, {transform_indices = @transform_10, window_bounds = array<i64: 3, 64, 5>}, {transform_indices = @transform_11, window_bounds = array<i64: 64, 128>}]} {
    %c0 = arith.constant 0 : index
    %c0_0 = arith.constant 0 : index
    %0 = vector.load %arg2[%c0, %c0_0] : memref<64x128xf32, #tpu.memory_space<vmem>>, vector<64x128xf32>
    %c0_1 = arith.constant 0 : index
    %c0_2 = arith.constant 0 : index
    %1 = vector.load %arg3[%c0_1, %c0_2] : memref<64x128xf32, #tpu.memory_space<vmem>>, vector<64x128xf32>
    %c0_3 = arith.constant 0 : index
    %c0_4 = arith.constant 0 : index
    %2 = vector.load %arg4[%c0_3, %c0_4] : memref<128x384xf32, #tpu.memory_space<vmem>>, vector<128x384xf32>
    %cst = arith.constant dense<0.000000e+00> : vector<64x384xf32>
    %3 = tpu.matmul %0, %2, %cst {dimension_numbers = #tpu.dot_dimension_numbers<[1], [0], [0], [1], [0, 0, 1, 1], [], []>} : vector<64x128xf32>, vector<128x384xf32>, vector<64x384xf32> -> vector<64x384xf32>
    %c0_5 = arith.constant 0 : index
    %c0_6 = arith.constant 0 : index
    %4 = vector.load %arg6[%c0_5, %c0_6] : memref<1x384xf32, #tpu.memory_space<vmem>>, vector<1x384xf32>
    %5 = vector.broadcast %4 : vector<1x384xf32> to vector<64x384xf32>
    %6 = arith.addf %3, %5 : vector<64x384xf32>
    %c0_7 = arith.constant 0 : index
    %c0_8 = arith.constant 0 : index
    %7 = vector.load %arg5[%c0_7, %c0_8] : memref<128x384xf32, #tpu.memory_space<vmem>>, vector<128x384xf32>
    %cst_9 = arith.constant dense<0.000000e+00> : vector<64x384xf32>
    %8 = tpu.matmul %1, %7, %cst_9 {dimension_numbers = #tpu.dot_dimension_numbers<[1], [0], [0], [1], [0, 0, 1, 1], [], []>} : vector<64x128xf32>, vector<128x384xf32>, vector<64x384xf32> -> vector<64x384xf32>
    %c0_10 = arith.constant 0 : index
    %c0_11 = arith.constant 0 : index
    %9 = vector.load %arg7[%c0_10, %c0_11] : memref<1x384xf32, #tpu.memory_space<vmem>>, vector<1x384xf32>
    %10 = vector.broadcast %9 : vector<1x384xf32> to vector<64x384xf32>
    %11 = arith.addf %8, %10 : vector<64x384xf32>
    %c0_12 = arith.constant 0 : index
    %c0_13 = arith.constant 0 : index
    %c0_14 = arith.constant 0 : index
    %12 = vector.load %arg1[%c0_12, %c0_13, %c0_14] : memref<3x64x5xf32, #tpu.memory_space<vmem>>, vector<1x64x5xf32>
    %13 = vector.shape_cast %12 : vector<1x64x5xf32> to vector<64x5xf32>
    %c0_15 = arith.constant 0 : index
    %c0_16 = arith.constant 0 : index
    %c0_17 = arith.constant 0 : index
    %14 = vector.load %arg1[%c0_15, %c0_16, %c0_17] : memref<3x64x5xf32, #tpu.memory_space<vmem>>, vector<1x64x5xf32>
    %15 = vector.shape_cast %14 : vector<1x64x5xf32> to vector<64x5xf32>
    %16 = arith.mulf %13, %15 : vector<64x5xf32>
    %c1 = arith.constant 1 : index
    %c0_18 = arith.constant 0 : index
    %c0_19 = arith.constant 0 : index
    %17 = vector.load %arg1[%c1, %c0_18, %c0_19] : memref<3x64x5xf32, #tpu.memory_space<vmem>>, vector<1x64x5xf32>
    %18 = vector.shape_cast %17 : vector<1x64x5xf32> to vector<64x5xf32>
    %c1_20 = arith.constant 1 : index
    %c0_21 = arith.constant 0 : index
    %c0_22 = arith.constant 0 : index
    %19 = vector.load %arg1[%c1_20, %c0_21, %c0_22] : memref<3x64x5xf32, #tpu.memory_space<vmem>>, vector<1x64x5xf32>
    %20 = vector.shape_cast %19 : vector<1x64x5xf32> to vector<64x5xf32>
    %21 = arith.mulf %18, %20 : vector<64x5xf32>
    %22 = arith.addf %16, %21 : vector<64x5xf32>
    %c2 = arith.constant 2 : index
    %c0_23 = arith.constant 0 : index
    %c0_24 = arith.constant 0 : index
    %23 = vector.load %arg1[%c2, %c0_23, %c0_24] : memref<3x64x5xf32, #tpu.memory_space<vmem>>, vector<1x64x5xf32>
    %24 = vector.shape_cast %23 : vector<1x64x5xf32> to vector<64x5xf32>
    %c2_25 = arith.constant 2 : index
    %c0_26 = arith.constant 0 : index
    %c0_27 = arith.constant 0 : index
    %25 = vector.load %arg1[%c2_25, %c0_26, %c0_27] : memref<3x64x5xf32, #tpu.memory_space<vmem>>, vector<1x64x5xf32>
    %26 = vector.shape_cast %25 : vector<1x64x5xf32> to vector<64x5xf32>
    %27 = arith.mulf %24, %26 : vector<64x5xf32>
    %28 = arith.addf %22, %27 : vector<64x5xf32>
    %cst_28 = arith.constant 9.99999997E-7 : f32
    %29 = vector.broadcast %cst_28 : f32 to vector<64x5xf32>
    %30 = arith.addf %28, %29 : vector<64x5xf32>
    %cst_29 = arith.constant 1.000000e+00 : f32
    %31 = vector.broadcast %cst_29 : f32 to vector<64x5xf32>
    %32 = arith.divf %31, %30 : vector<64x5xf32>
    %cst_30 = arith.constant 0.000000e+00 : f32
    %33 = vector.broadcast %cst_30 : f32 to vector<64x256xf32>
    %c0_31 = arith.constant 0 : index
    %c0_32 = arith.constant 0 : index
    %c0_33 = arith.constant 0 : index
    %34 = vector.load %arg1[%c0_31, %c0_32, %c0_33] : memref<3x64x5xf32, #tpu.memory_space<vmem>>, vector<1x64x5xf32>
    %35 = vector.shape_cast %34 : vector<1x64x5xf32> to vector<64x5xf32>
    %36 = arith.mulf %35, %32 : vector<64x5xf32>
    %c0_34 = arith.constant 0 : index
    %c0_35 = arith.constant 0 : index
    %37 = vector.load %arg8[%c0_34, %c0_35] : memref<5x256xf32, #tpu.memory_space<vmem>>, vector<5x256xf32>
    %cst_36 = arith.constant dense<0.000000e+00> : vector<64x256xf32>
    %38 = tpu.matmul %36, %37, %cst_36 {dimension_numbers = #tpu.dot_dimension_numbers<[1], [0], [0], [1], [0, 0, 1, 1], [], []>} : vector<64x5xf32>, vector<5x256xf32>, vector<64x256xf32> -> vector<64x256xf32>
    %c0_37 = arith.constant 0 : index
    %c0_38 = arith.constant 0 : index
    %39 = vector.load %arg9[%c0_37, %c0_38] : memref<5x256xf32, #tpu.memory_space<vmem>>, vector<5x256xf32>
    %cst_39 = arith.constant dense<0.000000e+00> : vector<64x256xf32>
    %40 = tpu.matmul %36, %39, %cst_39 {dimension_numbers = #tpu.dot_dimension_numbers<[1], [0], [0], [1], [0, 0, 1, 1], [], []>} : vector<64x5xf32>, vector<5x256xf32>, vector<64x256xf32> -> vector<64x256xf32>
    %41 = arith.mulf %38, %40 : vector<64x256xf32>
    %42 = arith.addf %33, %41 : vector<64x256xf32>
    %c1_40 = arith.constant 1 : index
    %c0_41 = arith.constant 0 : index
    %c0_42 = arith.constant 0 : index
    %43 = vector.load %arg1[%c1_40, %c0_41, %c0_42] : memref<3x64x5xf32, #tpu.memory_space<vmem>>, vector<1x64x5xf32>
    %44 = vector.shape_cast %43 : vector<1x64x5xf32> to vector<64x5xf32>
    %45 = arith.mulf %44, %32 : vector<64x5xf32>
    %c0_43 = arith.constant 0 : index
    %c0_44 = arith.constant 0 : index
    %46 = vector.load %arg8[%c0_43, %c0_44] : memref<5x256xf32, #tpu.memory_space<vmem>>, vector<5x256xf32>
    %cst_45 = arith.constant dense<0.000000e+00> : vector<64x256xf32>
    %47 = tpu.matmul %45, %46, %cst_45 {dimension_numbers = #tpu.dot_dimension_numbers<[1], [0], [0], [1], [0, 0, 1, 1], [], []>} : vector<64x5xf32>, vector<5x256xf32>, vector<64x256xf32> -> vector<64x256xf32>
    %c0_46 = arith.constant 0 : index
    %c0_47 = arith.constant 0 : index
    %48 = vector.load %arg9[%c0_46, %c0_47] : memref<5x256xf32, #tpu.memory_space<vmem>>, vector<5x256xf32>
    %cst_48 = arith.constant dense<0.000000e+00> : vector<64x256xf32>
    %49 = tpu.matmul %45, %48, %cst_48 {dimension_numbers = #tpu.dot_dimension_numbers<[1], [0], [0], [1], [0, 0, 1, 1], [], []>} : vector<64x5xf32>, vector<5x256xf32>, vector<64x256xf32> -> vector<64x256xf32>
    %50 = arith.mulf %47, %49 : vector<64x256xf32>
    %51 = arith.addf %42, %50 : vector<64x256xf32>
    %c2_49 = arith.constant 2 : index
    %c0_50 = arith.constant 0 : index
    %c0_51 = arith.constant 0 : index
    %52 = vector.load %arg1[%c2_49, %c0_50, %c0_51] : memref<3x64x5xf32, #tpu.memory_space<vmem>>, vector<1x64x5xf32>
    %53 = vector.shape_cast %52 : vector<1x64x5xf32> to vector<64x5xf32>
    %54 = arith.mulf %53, %32 : vector<64x5xf32>
    %c0_52 = arith.constant 0 : index
    %c0_53 = arith.constant 0 : index
    %55 = vector.load %arg8[%c0_52, %c0_53] : memref<5x256xf32, #tpu.memory_space<vmem>>, vector<5x256xf32>
    %cst_54 = arith.constant dense<0.000000e+00> : vector<64x256xf32>
    %56 = tpu.matmul %54, %55, %cst_54 {dimension_numbers = #tpu.dot_dimension_numbers<[1], [0], [0], [1], [0, 0, 1, 1], [], []>} : vector<64x5xf32>, vector<5x256xf32>, vector<64x256xf32> -> vector<64x256xf32>
    %c0_55 = arith.constant 0 : index
    %c0_56 = arith.constant 0 : index
    %57 = vector.load %arg9[%c0_55, %c0_56] : memref<5x256xf32, #tpu.memory_space<vmem>>, vector<5x256xf32>
    %cst_57 = arith.constant dense<0.000000e+00> : vector<64x256xf32>
    %58 = tpu.matmul %54, %57, %cst_57 {dimension_numbers = #tpu.dot_dimension_numbers<[1], [0], [0], [1], [0, 0, 1, 1], [], []>} : vector<64x5xf32>, vector<5x256xf32>, vector<64x256xf32> -> vector<64x256xf32>
    %59 = arith.mulf %56, %58 : vector<64x256xf32>
    %60 = arith.addf %51, %59 : vector<64x256xf32>
    %61 = vector.extract_strided_slice %6 {offsets = [0, 0], sizes = [64, 256], strides = [1, 1]} : vector<64x384xf32> to vector<64x256xf32>
    %62 = vector.extract_strided_slice %11 {offsets = [0, 0], sizes = [64, 256], strides = [1, 1]} : vector<64x384xf32> to vector<64x256xf32>
    %63 = arith.addf %61, %62 : vector<64x256xf32>
    %64 = arith.addf %63, %60 : vector<64x256xf32>
    %65 = arith.negf %64 : vector<64x256xf32>
    %66 = math.exp %65 : vector<64x256xf32>
    %cst_58 = arith.constant 1.000000e+00 : f32
    %67 = vector.broadcast %cst_58 : f32 to vector<64x256xf32>
    %68 = arith.addf %67, %66 : vector<64x256xf32>
    %69 = arith.divf %67, %68 : vector<64x256xf32>
    %70 = vector.extract_strided_slice %69 {offsets = [0, 0], sizes = [64, 128], strides = [1, 1]} : vector<64x256xf32> to vector<64x128xf32>
    %71 = vector.extract_strided_slice %69 {offsets = [0, 128], sizes = [64, 128], strides = [1, 1]} : vector<64x256xf32> to vector<64x128xf32>
    %72 = vector.extract_strided_slice %6 {offsets = [0, 256], sizes = [64, 128], strides = [1, 1]} : vector<64x384xf32> to vector<64x128xf32>
    %73 = vector.extract_strided_slice %11 {offsets = [0, 256], sizes = [64, 128], strides = [1, 1]} : vector<64x384xf32> to vector<64x128xf32>
    %74 = arith.mulf %70, %73 : vector<64x128xf32>
    %75 = arith.addf %72, %74 : vector<64x128xf32>
    %76 = math.tanh %75 : vector<64x128xf32>
    %c0_59 = arith.constant 0 : index
    %c0_60 = arith.constant 0 : index
    %77 = vector.load %arg10[%c0_59, %c0_60] : memref<1x128xf32, #tpu.memory_space<vmem>>, vector<1x128xf32>
    %78 = vector.broadcast %77 : vector<1x128xf32> to vector<64x128xf32>
    %79 = arith.mulf %76, %78 : vector<64x128xf32>
    %cst_61 = arith.constant dense<0.000000e+00> : vector<64xf32>
    %80 = vector.multi_reduction <add>, %79, %cst_61 [1] : vector<64x128xf32> to vector<64xf32>
    %81 = vector.shape_cast %80 : vector<64xf32> to vector<64x1xf32>
    %c0_62 = arith.constant 0 : index
    %c0_63 = arith.constant 0 : index
    %c0_64 = arith.constant 0 : index
    %82 = vector.load %arg1[%c0_62, %c0_63, %c0_64] : memref<3x64x5xf32, #tpu.memory_space<vmem>>, vector<1x64x5xf32>
    %83 = vector.shape_cast %82 : vector<1x64x5xf32> to vector<64x5xf32>
    %84 = vector.broadcast %81 : vector<64x1xf32> to vector<64x5xf32>
    %85 = arith.mulf %83, %84 : vector<64x5xf32>
    %c0_65 = arith.constant 0 : index
    %c0_66 = arith.constant 0 : index
    %c0_67 = arith.constant 0 : index
    %86 = vector.load %arg11[%c0_65, %c0_66, %c0_67] : memref<3x64x5xf32, #tpu.memory_space<vmem>>, vector<1x64x5xf32>
    %87 = vector.shape_cast %86 : vector<1x64x5xf32> to vector<64x5xf32>
    %88 = vector.shape_cast %85 : vector<64x5xf32> to vector<1x64x5xf32>
    tpu.vector_store %arg11[%c0_65, %c0_66, %c0_67], %88 {strides = array<i32>} : memref<3x64x5xf32, #tpu.memory_space<vmem>>, vector<1x64x5xf32>,
    %c1_68 = arith.constant 1 : index
    %c0_69 = arith.constant 0 : index
    %c0_70 = arith.constant 0 : index
    %89 = vector.load %arg1[%c1_68, %c0_69, %c0_70] : memref<3x64x5xf32, #tpu.memory_space<vmem>>, vector<1x64x5xf32>
    %90 = vector.shape_cast %89 : vector<1x64x5xf32> to vector<64x5xf32>
    %91 = vector.broadcast %81 : vector<64x1xf32> to vector<64x5xf32>
    %92 = arith.mulf %90, %91 : vector<64x5xf32>
    %c1_71 = arith.constant 1 : index
    %c0_72 = arith.constant 0 : index
    %c0_73 = arith.constant 0 : index
    %93 = vector.load %arg11[%c1_71, %c0_72, %c0_73] : memref<3x64x5xf32, #tpu.memory_space<vmem>>, vector<1x64x5xf32>
    %94 = vector.shape_cast %93 : vector<1x64x5xf32> to vector<64x5xf32>
    %95 = vector.shape_cast %92 : vector<64x5xf32> to vector<1x64x5xf32>
    tpu.vector_store %arg11[%c1_71, %c0_72, %c0_73], %95 {strides = array<i32>} : memref<3x64x5xf32, #tpu.memory_space<vmem>>, vector<1x64x5xf32>,
    %c2_74 = arith.constant 2 : index
    %c0_75 = arith.constant 0 : index
    %c0_76 = arith.constant 0 : index
    %96 = vector.load %arg1[%c2_74, %c0_75, %c0_76] : memref<3x64x5xf32, #tpu.memory_space<vmem>>, vector<1x64x5xf32>
    %97 = vector.shape_cast %96 : vector<1x64x5xf32> to vector<64x5xf32>
    %98 = vector.broadcast %81 : vector<64x1xf32> to vector<64x5xf32>
    %99 = arith.mulf %97, %98 : vector<64x5xf32>
    %c2_77 = arith.constant 2 : index
    %c0_78 = arith.constant 0 : index
    %c0_79 = arith.constant 0 : index
    %100 = vector.load %arg11[%c2_77, %c0_78, %c0_79] : memref<3x64x5xf32, #tpu.memory_space<vmem>>, vector<1x64x5xf32>
    %101 = vector.shape_cast %100 : vector<1x64x5xf32> to vector<64x5xf32>
    %102 = vector.shape_cast %99 : vector<64x5xf32> to vector<1x64x5xf32>
    tpu.vector_store %arg11[%c2_77, %c0_78, %c0_79], %102 {strides = array<i32>} : memref<3x64x5xf32, #tpu.memory_space<vmem>>, vector<1x64x5xf32>,
    %cst_80 = arith.constant 1.000000e+00 : f32
    %103 = vector.broadcast %cst_80 : f32 to vector<64x128xf32>
    %104 = arith.subf %103, %71 : vector<64x128xf32>
    %105 = arith.mulf %104, %76 : vector<64x128xf32>
    %106 = arith.mulf %71, %1 : vector<64x128xf32>
    %107 = arith.addf %105, %106 : vector<64x128xf32>
    %c0_81 = arith.constant 0 : index
    %c0_82 = arith.constant 0 : index
    %108 = vector.load %arg12[%c0_81, %c0_82] : memref<64x128xf32, #tpu.memory_space<vmem>>, vector<64x128xf32>
    tpu.vector_store %arg12[%c0_81, %c0_82], %107 {strides = array<i32>} : memref<64x128xf32, #tpu.memory_space<vmem>>, vector<64x128xf32>,
    return
  }
  func.func @transform_0(%arg0: i32) -> (i32, i32, i32) {
    %c0_i32 = arith.constant 0 : i32
    %c0_i32_0 = arith.constant 0 : i32
    %c0_i32_1 = arith.constant 0 : i32
    return %c0_i32, %arg0, %c0_i32_0 : i32, i32, i32
  }
  func.func @transform_1(%arg0: i32) -> (i32, i32) {
    %c0_i32 = arith.constant 0 : i32
    %c0_i32_0 = arith.constant 0 : i32
    return %arg0, %c0_i32 : i32, i32
  }
  func.func @transform_2(%arg0: i32) -> (i32, i32) {
    %c0_i32 = arith.constant 0 : i32
    %c0_i32_0 = arith.constant 0 : i32
    return %arg0, %c0_i32 : i32, i32
  }
  func.func @transform_3(%arg0: i32) -> (i32, i32) {
    %c0_i32 = arith.constant 0 : i32
    %c0_i32_0 = arith.constant 0 : i32
    %c0_i32_1 = arith.constant 0 : i32
    return %c0_i32, %c0_i32_0 : i32, i32
  }
  func.func @transform_4(%arg0: i32) -> (i32, i32) {
    %c0_i32 = arith.constant 0 : i32
    %c0_i32_0 = arith.constant 0 : i32
    %c0_i32_1 = arith.constant 0 : i32
    return %c0_i32, %c0_i32_0 : i32, i32
  }
  func.func @transform_5(%arg0: i32) -> (i32, i32) {
    %c0_i32 = arith.constant 0 : i32
    %c0_i32_0 = arith.constant 0 : i32
    %c0_i32_1 = arith.constant 0 : i32
    return %c0_i32, %c0_i32_0 : i32, i32
  }
  func.func @transform_6(%arg0: i32) -> (i32, i32) {
    %c0_i32 = arith.constant 0 : i32
    %c0_i32_0 = arith.constant 0 : i32
    %c0_i32_1 = arith.constant 0 : i32
    return %c0_i32, %c0_i32_0 : i32, i32
  }
  func.func @transform_7(%arg0: i32) -> (i32, i32) {
    %c0_i32 = arith.constant 0 : i32
    %c0_i32_0 = arith.constant 0 : i32
    %c0_i32_1 = arith.constant 0 : i32
    return %c0_i32, %c0_i32_0 : i32, i32
  }
  func.func @transform_8(%arg0: i32) -> (i32, i32) {
    %c0_i32 = arith.constant 0 : i32
    %c0_i32_0 = arith.constant 0 : i32
    %c0_i32_1 = arith.constant 0 : i32
    return %c0_i32, %c0_i32_0 : i32, i32
  }
  func.func @transform_9(%arg0: i32) -> (i32, i32) {
    %c0_i32 = arith.constant 0 : i32
    %c0_i32_0 = arith.constant 0 : i32
    %c0_i32_1 = arith.constant 0 : i32
    return %c0_i32, %c0_i32_0 : i32, i32
  }
  func.func @transform_10(%arg0: i32) -> (i32, i32, i32) {
    %c0_i32 = arith.constant 0 : i32
    %c0_i32_0 = arith.constant 0 : i32
    %c0_i32_1 = arith.constant 0 : i32
    return %c0_i32, %arg0, %c0_i32_0 : i32, i32, i32
  }
  func.func @transform_11(%arg0: i32) -> (i32, i32) {
    %c0_i32 = arith.constant 0 : i32
    %c0_i32_0 = arith.constant 0 : i32
    return %arg0, %c0_i32 : i32, i32
  }
}

</mosaic_0001>

<bundles_post_ra>
// kernel: rye_gru.1
= control target key start
LH: loop header
LB: loop body
LE: loop exit
PB: predicated region body
PF: predicated region fallthrough
CT: control target
= control target key end

     0   :  { %v2308_v50 = vmov 0.0   ;;  %s3672_s0 = inlined_call_operand.vmem [shape: f32[3,64,5], index: 0, kind: input, shape index: {}]   ;;  %s3673_s1 = inlined_call_operand.vmem [shape: f32[64,128], index: 1, kind: input, shape index: {}]   ;;  %s3674_s2 = inlined_call_operand.vmem [shape: f32[64,128], index: 2, kind: input, shape index: {}]   ;;  %s3675_s3 = inlined_call_operand.vmem [shape: f32[128,384], index: 3, kind: input, shape index: {}]   ;;  %s3676_s4 = inlined_call_operand.vmem [shape: f32[128,384], index: 4, kind: input, shape index: {}]   ;;  %s3677_s5 = inlined_call_operand.vmem [shape: f32[1,384], index: 5, kind: input, shape index: {}]   ;;  %s3678_s6 = inlined_call_operand.vmem [shape: f32[1,384], index: 6, kind: input, shape index: {}]   ;;  %s3679_s7 = inlined_call_operand.vmem [shape: f32[5,256], index: 7, kind: input, shape index: {}]   ;;  %s3680_s8 = inlined_call_operand.vmem [shape: f32[5,256], index: 8, kind: input, shape index: {}]   ;;  %s3681_s9 = inlined_call_operand.vmem [shape: f32[1,128], index: 9, kind: input, shape index: {}]   ;;  %s3682_s10 = inlined_call_operand.vmem [shape: f32[3,64,5], index: 10, kind: output, shape index: {0}]   ;;  %s3683_s11 = inlined_call_operand.hbm [shape: f32[64,128], index: 11, kind: output, shape index: {1}]  }
   0x1   :  { %v100_v0 = vld [vmem:[%s3675_s3 + $0x170] sm:$0xff]  ;;  %v101_v1 = vld [vmem:[%s3675_s3 + $0x178] sm:$0xff]  ;;  %v99_v2 = vld [vmem:[%s3675_s3 + $0x168] sm:$0xff]  ;;  %183 = vmatprep.mubr.f32.mxu0 %v2308_v50 }
   0x2   :  { %119 = vmatprep.subr.mxu0 %v100_v0  ;;  %2080 = vmatprep.subr.mxu1 %v101_v1  ;;  %v97_v3 = vld [vmem:[%s3675_s3 + $0x158] sm:$0xff]  ;;  %v98_v4 = vld [vmem:[%s3675_s3 + $0x160] sm:$0xff]  ;;  %v96_v5 = vld [vmem:[%s3675_s3 + $0x150] sm:$0xff] }
   0x3   :  { %120 = vmatpush1.msra.mxu0 %v99_v2  ;;  %2081 = vmatpush3.msra.mxu1 %v101_v1  ;;  %v94_v6 = vld [vmem:[%s3675_s3 + $0x140] sm:$0xff]  ;;  %v95_v7 = vld [vmem:[%s3675_s3 + $0x148] sm:$0xff]  ;;  %v93_v8 = vld [vmem:[%s3675_s3 + $0x138] sm:$0xff] }
   0x4   :  { %121 = vmatprep.subr.mxu0 %v97_v3  ;;  %2082 = vmatprep.subr.mxu1 %v98_v4  ;;  %v91_v9 = vld [vmem:[%s3675_s3 + $0x128] sm:$0xff]  ;;  %v92_v10 = vld [vmem:[%s3675_s3 + $0x130] sm:$0xff]  ;;  %v90_v11 = vld [vmem:[%s3675_s3 + $0x120] sm:$0xff] }
   0x5   :  { %122 = vmatpush1.msra.mxu0 %v96_v5  ;;  %2083 = vmatpush3.msra.mxu1 %v98_v4  ;;  %v88_v12 = vld [vmem:[%s3675_s3 + $0x110] sm:$0xff]  ;;  %v89_v13 = vld [vmem:[%s3675_s3 + $0x118] sm:$0xff]  ;;  %v87_v14 = vld [vmem:[%s3675_s3 + $0x108] sm:$0xff] }
   0x6   :  { %123 = vmatprep.subr.mxu0 %v94_v6  ;;  %2084 = vmatprep.subr.mxu1 %v95_v7  ;;  %v85_v15 = vld [vmem:[%s3675_s3 + $0xf8] sm:$0xff]  ;;  %v86_v16 = vld [vmem:[%s3675_s3 + $0x100] sm:$0xff]  ;;  %v84_v17 = vld [vmem:[%s3675_s3 + $0xf0] sm:$0xff] }
   0x7   :  { %124 = vmatpush1.msra.mxu0 %v93_v8  ;;  %2085 = vmatpush3.msra.mxu1 %v95_v7  ;;  %v82_v18 = vld [vmem:[%s3675_s3 + $0xe0] sm:$0xff]  ;;  %v83_v19 = vld [vmem:[%s3675_s3 + $0xe8] sm:$0xff]  ;;  %v81_v20 = vld [vmem:[%s3675_s3 + $0xd8] sm:$0xff] }
   0x8   :  { %125 = vmatprep.subr.mxu0 %v91_v9  ;;  %2086 = vmatprep.subr.mxu1 %v92_v10  ;;  %v79_v21 = vld [vmem:[%s3675_s3 + $0xc8] sm:$0xff]  ;;  %v80_v22 = vld [vmem:[%s3675_s3 + $0xd0] sm:$0xff]  ;;  %v78_v23 = vld [vmem:[%s3675_s3 + $0xc0] sm:$0xff] }
   0x9   :  { %126 = vmatpush1.msra.mxu0 %v90_v11  ;;  %2087 = vmatpush3.msra.mxu1 %v92_v10  ;;  %v76_v24 = vld [vmem:[%s3675_s3 + $0xb0] sm:$0xff]  ;;  %v77_v25 = vld [vmem:[%s3675_s3 + $0xb8] sm:$0xff]  ;;  %v75_v26 = vld [vmem:[%s3675_s3 + $0xa8] sm:$0xff] }
   0xa   :  { %127 = vmatprep.subr.mxu0 %v88_v12  ;;  %2088 = vmatprep.subr.mxu1 %v89_v13  ;;  %v73_v27 = vld [vmem:[%s3675_s3 + $0x98] sm:$0xff]  ;;  %v74_v28 = vld [vmem:[%s3675_s3 + $0xa0] sm:$0xff]  ;;  %v72_v29 = vld [vmem:[%s3675_s3 + $0x90] sm:$0xff] }
   0xb   :  { %128 = vmatpush1.msra.mxu0 %v87_v14  ;;  %2089 = vmatpush3.msra.mxu1 %v89_v13  ;;  %v70_v30 = vld [vmem:[%s3675_s3 + $0x80] sm:$0xff]  ;;  %v71_v31 = vld [vmem:[%s3675_s3 + $0x88] sm:$0xff]  ;;  %v69_v32 = vld [vmem:[%s3675_s3 + $0x78] sm:$0xff] }
   0xc   :  { %129 = vmatprep.subr.mxu0 %v85_v15  ;;  %2090 = vmatprep.subr.mxu1 %v86_v16  ;;  %v67_v33 = vld [vmem:[%s3675_s3 + $0x68] sm:$0xff]  ;;  %v68_v34 = vld [vmem:[%s3675_s3 + $0x70] sm:$0xff]  ;;  %v66_v35 = vld [vmem:[%s3675_s3 + $0x60] sm:$0xff] }
   0xd   :  { %130 = vmatpush1.msra.mxu0 %v84_v17  ;;  %2091 = vmatpush3.msra.mxu1 %v86_v16  ;;  %v64_v36 = vld [vmem:[%s3675_s3 + $0x50] sm:$0xff]  ;;  %v65_v37 = vld [vmem:[%s3675_s3 + $0x58] sm:$0xff]  ;;  %v63_v38 = vld [vmem:[%s3675_s3 + $0x48] sm:$0xff] }
   0xe   :  { %131 = vmatprep.subr.mxu0 %v82_v18  ;;  %2092 = vmatprep.subr.mxu1 %v83_v19  ;;  %v61_v39 = vld [vmem:[%s3675_s3 + $0x38] sm:$0xff]  ;;  %v62_v40 = vld [vmem:[%s3675_s3 + $0x40] sm:$0xff]  ;;  %v60_v41 = vld [vmem:[%s3675_s3 + $0x30] sm:$0xff] }
   0xf   :  { %132 = vmatpush1.msra.mxu0 %v81_v20  ;;  %2093 = vmatpush3.msra.mxu1 %v83_v19  ;;  %v58_v42 = vld [vmem:[%s3675_s3 + $0x20] sm:$0xff]  ;;  %v59_v43 = vld [vmem:[%s3675_s3 + $0x28] sm:$0xff]  ;;  %v57_v44 = vld [vmem:[%s3675_s3 + $0x18] sm:$0xff] }
  0x10   :  { %133 = vmatprep.subr.mxu0 %v79_v21  ;;  %2094 = vmatprep.subr.mxu1 %v80_v22  ;;  %v55_v45 = vld [vmem:[%s3675_s3 + $0x8] sm:$0xff]  ;;  %v56_v46 = vld [vmem:[%s3675_s3 + $0x10] sm:$0xff]  ;;  %v54_v47 = vld [vmem:[%s3675_s3] sm:$0xff] }
  0x11   :  { %134 = vmatpush1.msra.mxu0 %v78_v23  ;;  %2095 = vmatpush3.msra.mxu1 %v80_v22  ;;  %v38_v48 = vld [vmem:[%s3673_s1] sm:$0xff]  ;;  %v39_v49 = vld [vmem:[%s3673_s1 + $0x8] sm:$0xff]  ;;  %v383_v51 = vld [vmem:[%s3676_s4 + $0x170] sm:$0xff] }
  0x12   :  { %135 = vmatprep.subr.mxu0 %v76_v24  ;;  %2096 = vmatprep.subr.mxu1 %v77_v25  ;;  %v384_v52 = vld [vmem:[%s3676_s4 + $0x178] sm:$0xff]  ;;  %v382_v53 = vld [vmem:[%s3676_s4 + $0x168] sm:$0xff]  ;;  %v381_v55 = vld [vmem:[%s3676_s4 + $0x160] sm:$0xff] }
  0x13   :  { %136 = vmatpush1.msra.mxu0 %v75_v26  ;;  %2097 = vmatpush3.msra.mxu1 %v77_v25  ;;  %v380_v54 = vld [vmem:[%s3676_s4 + $0x158] sm:$0xff]  ;;  %v379_v56 = vld [vmem:[%s3676_s4 + $0x150] sm:$0xff]  ;;  %v377_v57 = vld [vmem:[%s3676_s4 + $0x140] sm:$0xff] }
  0x14   :  { %137 = vmatprep.subr.mxu0 %v73_v27  ;;  %2098 = vmatprep.subr.mxu1 %v74_v28  ;;  %v378_v58 = vld [vmem:[%s3676_s4 + $0x148] sm:$0xff]  ;;  %v376_v59 = vld [vmem:[%s3676_s4 + $0x138] sm:$0xff]  ;;  %v375_v61 = vld [vmem:[%s3676_s4 + $0x130] sm:$0xff] }
  0x15   :  { %138 = vmatpush1.msra.mxu0 %v72_v29  ;;  %2099 = vmatpush3.msra.mxu1 %v74_v28  ;;  %v374_v60 = vld [vmem:[%s3676_s4 + $0x128] sm:$0xff]  ;;  %v373_v62 = vld [vmem:[%s3676_s4 + $0x120] sm:$0xff]  ;;  %v2568_v0 = vld [vmem:[%s3673_s1 + $0x10] sm:$0xff] }
  0x16   :  { %139 = vmatprep.subr.mxu0 %v70_v30  ;;  %2100 = vmatprep.subr.mxu1 %v71_v31  ;;  %v2563_v63 = vld [vmem:[%s3672_s0] sm:$0xff]  ;;  %v2585_v4 = vld [vmem:[%s3672_s0 + $0x8] sm:$0xff]  ;;  %v371_v5 = vld [vmem:[%s3676_s4 + $0x110] sm:$0xff] }
  0x17   :  { %140 = vmatpush1.msra.mxu0 %v69_v32  ;;  %2101 = vmatpush3.msra.mxu1 %v71_v31  ;;  %v628_v1 = vmul.f32 %v2563_v63, %v2563_v63  ;;  %v2575_v2 = vld [vmem:[%s3672_s0 + $0x40] sm:$0xff]  ;;  %v372_v6 = vld [vmem:[%s3676_s4 + $0x118] sm:$0xff]  ;;  %v629_v9 = vmul.f32 %v2585_v4, %v2585_v4  ;;  %v2602_v10 = vld [vmem:[%s3672_s0 + $0x48] sm:$0xff] }
  0x18   :  { %141 = vmatprep.subr.mxu0 %v67_v33  ;;  %2102 = vmatprep.subr.mxu1 %v68_v34  ;;  %v2580_v3 = vld [vmem:[%s3672_s0 + $0x80] sm:$0xff]  ;;  %v645_v7 = vmul.f32 %v2575_v2, %v2575_v2  ;;  %v2607_v11 = vld [vmem:[%s3672_s0 + $0x88] sm:$0xff]  ;;  %v2612_v12 = vld [vmem:[%s3672_s0 + $0x10] sm:$0xff]  ;;  %v646_v14 = vmul.f32 %v2602_v10, %v2602_v10 }
  0x19   :  { %142 = vmatpush1.msra.mxu0 %v66_v35  ;;  %2103 = vmatpush3.msra.mxu1 %v68_v34  ;;  %v670_v8 = vmul.f32 %v2580_v3, %v2580_v3  ;;  %v370_v13 = vld [vmem:[%s3676_s4 + $0x108] sm:$0xff]  ;;  %v671_v15 = vmul.f32 %v2607_v11, %v2607_v11  ;;  %v630_v16 = vmul.f32 %v2612_v12, %v2612_v12  ;;  %v2626_v17 = vld [vmem:[%s3672_s0 + $0x50] sm:$0xff]  ;;  %v2636_v19 = vld [vmem:[%s3672_s0 + $0x18] sm:$0xff] }
  0x1a   :  { %143 = vmatprep.subr.mxu0 %v64_v36  ;;  %2104 = vmatprep.subr.mxu1 %v65_v37  ;;  %v2631_v18 = vld [vmem:[%s3672_s0 + $0x90] sm:$0xff]  ;;  %v653_v20 = vadd.f32 %v645_v7, %v628_v1  ;;  %v647_v21 = vmul.f32 %v2626_v17, %v2626_v17  ;;  %v2645_v23 = vld [vmem:[%s3672_s0 + $0x58] sm:$0xff]  ;;  %v2655_v25 = vld [vmem:[%s3672_s0 + $0x20] sm:$0xff]  ;;  %v654_v27 = vadd.f32 %v646_v14, %v629_v9 }
  0x1b   :  { %144 = vmatpush1.msra.mxu0 %v63_v38  ;;  %2105 = vmatpush3.msra.mxu1 %v65_v37  ;;  %v672_v22 = vmul.f32 %v2631_v18, %v2631_v18  ;;  %v2650_v24 = vld [vmem:[%s3672_s0 + $0x98] sm:$0xff]  ;;  %v631_v28 = vmul.f32 %v2636_v19, %v2636_v19  ;;  %v648_v29 = vmul.f32 %v2645_v23, %v2645_v23  ;;  %v2668_v30 = vld [vmem:[%s3672_s0 + $0x60] sm:$0xff]  ;;  %v2684_v36 = vld [vmem:[%s3672_s0 + $0x28] sm:$0xff] }
  0x1c   :  { %145 = vmatprep.subr.mxu0 %v61_v39  ;;  %2106 = vmatprep.subr.mxu1 %v62_v40  ;;  %v368_v26 = vld [vmem:[%s3676_s4 + $0xf8] sm:$0xff]  ;;  %v2673_v31 = vld [vmem:[%s3672_s0 + $0xa0] sm:$0xff]  ;;  %v678_v33 = vadd.f32 %v670_v8, %v653_v20  ;;  %v655_v34 = vadd.f32 %v647_v21, %v630_v16  ;;  %v673_v35 = vmul.f32 %v2650_v24, %v2650_v24  ;;  %v2689_v37 = vld [vmem:[%s3672_s0 + $0x68] sm:$0xff] }
  0x1d   :  { %146 = vmatpush1.msra.mxu0 %v60_v41  ;;  %2107 = vmatpush3.msra.mxu1 %v62_v40  ;;  %v369_v32 = vld [vmem:[%s3676_s4 + $0x100] sm:$0xff]  ;;  %v367_v38 = vld [vmem:[%s3676_s4 + $0xf0] sm:$0xff]  ;;  %v2697_v39 = vld [vmem:[%s3673_s1 + $0x18] sm:$0xff]  ;;  %v679_v40 = vadd.f32 %v671_v15, %v654_v27  ;;  %v656_v41 = vadd.f32 %v648_v29, %v631_v28 }
  0x1e   :  { %147 = vmatprep.subr.mxu0 %v58_v42  ;;  %2108 = vmatprep.subr.mxu1 %v59_v43  ;;  %v632_v42 = vmul.f32 %v2655_v25, %v2655_v25 }
  0x1f   :  { %148 = vmatpush1.msra.mxu0 %v57_v44  ;;  %2109 = vmatpush3.msra.mxu1 %v59_v43  ;;  %v2704_v43 = vld [vmem:[%s3672_s0 + $0xa8] sm:$0xff]  ;;  %v365_v44 = vld [vmem:[%s3676_s4 + $0xe0] sm:$0xff] }
  0x20   :  { %149 = vmatprep.subr.mxu0 %v55_v45  ;;  %2110 = vmatprep.subr.mxu1 %v56_v46  ;;  %v686_v45 = vadd.f32 1e-06, %v678_v33 }
  0x21   :  { %150 = vmatpush1.msra.mxu0 %v54_v47  ;;  %2111 = vmatpush3.msra.mxu1 %v56_v46  ;;  %v680_v46 = vadd.f32 %v672_v22, %v655_v34  ;;  %v649_v47 = vmul.f32 %v2668_v30, %v2668_v30 }
  0x22   :  { %2112 = vmatprep.mubr.f32.mxu1 %v38_v48  ;;  %184 = vmatmul.mubr.f32.vlgmr.msra.gmra.mxu0 %v38_v48  ;;  %v674_v48 = vmul.f32 %v2673_v31, %v2673_v31 }
  0x23   :  { %2113 = vmatmul.mubr.f32.vlgmr.msra.gmra.mxu1 %v39_v49  ;;  %402 = vmatprep.subr.mxu0 %v383_v51 }
  0x24   :  { %2124 = vmatprep.subr.mxu1 %v384_v52  ;;  %403 = vmatpush1.msra.mxu0 %v382_v53 }
  0x25   :  { %2125 = vmatpush3.msra.mxu1 %v384_v52  ;;  %404 = vmatprep.subr.mxu0 %v380_v54 }
  0x26   :  { %2126 = vmatprep.subr.mxu1 %v381_v55  ;;  %189 = vmatprep.mubr.f32.mxu0 %v2308_v50 }
  0x27   :  { %405 = vmatpush1.msra.mxu0 %v379_v56  ;;  %2127 = vmatpush3.msra.mxu1 %v381_v55 }
  0x28   :  { %190 = vmatmul.mubr.f32.gmra.mxu0 %v39_v49  ;;  %406 = vmatprep.subr.mxu0 %v377_v57  ;;  %v2716_v49 = vld [vmem:[%s3672_s0 + $0x30] sm:$0xff] }
  0x29   :  { %2128 = vmatprep.subr.mxu1 %v378_v58  ;;  %407 = vmatpush1.msra.mxu0 %v376_v59 }
  0x2a   :  { %2129 = vmatpush3.msra.mxu1 %v378_v58  ;;  %408 = vmatprep.subr.mxu0 %v374_v60 }
  0x2b   :  { %2130 = vmatprep.subr.mxu1 %v375_v61  ;;  %195 = vmatprep.mubr.f32.mxu0 %v2308_v50 }
  0x2c   :  { %409 = vmatpush1.msra.mxu0 %v373_v62  ;;  %2131 = vmatpush3.msra.mxu1 %v375_v61 }
  0x2d   :  { %196 = vmatmul.mubr.f32.gmra.mxu0 %v2568_v0  ;;  %410 = vmatprep.subr.mxu0 %v371_v5 }
  0x2e   :  { %2132 = vmatprep.subr.mxu1 %v372_v6  ;;  %411 = vmatpush1.msra.mxu0 %v370_v13 }
  0x2f   :  { %2133 = vmatpush3.msra.mxu1 %v372_v6 }
  0x30   :  { %17 = vsyncpa [#allocation3], 0  ;;  %412 = vmatprep.subr.mxu0 %v368_v26  ;;  %2134 = vmatprep.subr.mxu1 %v369_v32  ;;  %v366_v51 = vld [vmem:[%s3676_s4 + $0xe8] sm:$0xff]  ;;  %v687_v52 = vadd.f32 1e-06, %v679_v40  ;;  %v681_v53 = vadd.f32 %v673_v35, %v656_v41  ;;  %v633_v54 = vmul.f32 %v2684_v36, %v2684_v36  ;;  %v650_v55 = vmul.f32 %v2689_v37, %v2689_v37  ;;  %v2728_v56 = vld [vmem:[%s3672_s0 + $0x70] sm:$0xff] }
  0x31   :  { %v2733_v57 = vld [vmem:[%s3672_s0 + $0xb0] sm:$0xff]  ;;  %201 = vmatprep.mubr.f32.mxu0 %v2308_v50  ;;  %413 = vmatpush1.msra.mxu0 %v367_v38  ;;  %v364_v58 = vld [vmem:[%s3676_s4 + $0xd8] sm:$0xff]  ;;  %2174 = vrcp.f32 %v686_v45  ;;  %v688_v59 = vadd.f32 1e-06, %v680_v46  ;;  %v657_v60 = vadd.f32 %v649_v47, %v632_v42  ;;  %v675_v61 = vmul.f32 %v2704_v43, %v2704_v43  ;;  %v362_v5 = vld [vmem:[%s3676_s4 + $0xc8] sm:$0xff]  ;;  %s2309_s12 = smov [#allocation2]  }
  0x32   :  { %v2744_v62 = vld [vmem:[%s3672_s0 + $0x38] sm:$0xff]  ;;  %2135 = vmatpush3.msra.mxu1 %v369_v32  ;;  %202 = vmatmul.mubr.f32.gmra.mxu0 %v2697_v39  ;;  %v363_v6 = vld [vmem:[%s3676_s4 + $0xd0] sm:$0xff]  ;;  %2176 = vrcp.f32 %v687_v52  ;;  %v689_v7 = vadd.f32 1e-06, %v681_v53  ;;  %v658_v8 = vadd.f32 %v650_v55, %v633_v54  ;;  %v634_v9 = vmul.f32 %v2716_v49, %v2716_v49  ;;  %v361_v14 = vld [vmem:[%s3676_s4 + $0xc0] sm:$0xff]  ;;  %s1894_s13 = sshll.u32 %s2309_s12, 4  ;;  %s1895_s13 = int_to_ptr.vmem [resolvable:$true] %s1894_s13 }
  0x33   :  { %v2749_v1 = vld [vmem:[%s3672_s0 + $0x78] sm:$0xff]  ;;  %414 = vmatprep.subr.mxu0 %v365_v44  ;;  %2136 = vmatprep.subr.mxu1 %v366_v51  ;;  %2178 = vrcp.f32 %v688_v59  ;;  %v682_v15 = vadd.f32 %v674_v48, %v657_v60  ;;  %v651_v16 = vmul.f32 %v2728_v56, %v2728_v56  ;;  %v676_v20 = vmul.f32 %v2733_v57, %v2733_v57  ;;  %v42_v21 = vld [vmem:[%s3673_s1 + $0x20] sm:$0xff]  ;;  %v359_v28 = vld [vmem:[%s3676_s4 + $0xb0] sm:$0xff]  ;;  %s2286_s14 = scalar_lea.vmem %s1895_s13, 1024  ;;  %p2291_p1 = scmp.lt.s32.totalorder %s1895_s13, %s1895_s13 }
  0x34   :  { %v2763_v13 = vld [vmem:[%s3672_s0 + $0xb8] sm:$0xff]  ;;  %415 = vmatpush1.msra.mxu0 %v364_v58  ;;  %2137 = vmatpush3.msra.mxu1 %v366_v51  ;;  %2180 = vrcp.f32 %v689_v7  ;;  %v683_v22 = vadd.f32 %v675_v61, %v658_v8  ;;  %v635_v26 = vmul.f32 %v2744_v62, %v2744_v62  ;;  %v652_v27 = vmul.f32 %v2749_v1, %v2749_v1  ;;  %v358_v35 = vld [vmem:[%s3676_s4 + $0xa8] sm:$0xff]  ;;  %v357_v44 = vld [vmem:[%s3676_s4 + $0xa0] sm:$0xff]  ;;  %p2287_p0 = scmp.ne.s32.totalorder %s1895_s13, %s2286_s14  ;;  %p2292_p2 = scmp.lt.s32.totalorder %s2286_s14, %s2286_s14 }
  0x35   :  { %416 = vmatprep.subr.mxu0 %v362_v5  ;;  %2138 = vmatprep.subr.mxu1 %v363_v6  ;;  %v360_v29 = vld [vmem:[%s3676_s4 + $0xb8] sm:$0xff]  ;;  %v690_v32 = vadd.f32 1e-06, %v682_v15  ;;  %v659_v33 = vadd.f32 %v651_v16, %v634_v9  ;;  %v677_v34 = vmul.f32 %v2763_v13, %v2763_v13  ;;  %v355_v46 = vld [vmem:[%s3676_s4 + $0x90] sm:$0xff]  ;;  %v43_v48 = vld [vmem:[%s3673_s1 + $0x28] sm:$0xff]  ;;  %vm745_vm0 = vcmask 1044480  }
  0x36   :  { %207 = vmatprep.mubr.f32.mxu0 %v2308_v50  ;;  %417 = vmatpush1.msra.mxu0 %v361_v14  ;;  %v691_v38 = vadd.f32 1e-06, %v683_v22  ;;  %v660_v40 = vadd.f32 %v652_v27, %v635_v26  ;;  %v356_v41 = vld [vmem:[%s3676_s4 + $0x98] sm:$0xff]  ;;  %v353_v52 = vld [vmem:[%s3676_s4 + $0x80] sm:$0xff]  ;;  %v354_v53 = vld [vmem:[%s3676_s4 + $0x88] sm:$0xff]  ;;  %vm720_vm1 = vcmask 39936   ;;  %p2293_p3 = por %p2292_p2, %p2291_p1 }
  0x37   :  { %2139 = vmatpush3.msra.mxu1 %v363_v6  ;;  %208 = vmatmul.mubr.f32.gmra.mxu0 %v42_v21  ;;  %2182 = vrcp.f32 %v690_v32  ;;  %v684_v42 = vadd.f32 %v676_v20, %v659_v33  ;;  %v350_v54 = vld [vmem:[%s3676_s4 + $0x68] sm:$0xff]  ;;  %v349_v59 = vld [vmem:[%s3676_s4 + $0x60] sm:$0xff]  ;;  %v44_v5 = vld [vmem:[%s3673_s1 + $0x30] sm:$0xff] }
  0x38   :  { %418 = vmatprep.subr.mxu0 %v359_v28  ;;  %2140 = vmatprep.subr.mxu1 %v360_v29  ;;  %2184 = vrcp.f32 %v691_v38  ;;  %v685_v45 = vadd.f32 %v677_v34, %v660_v40  ;;  %v348_v8 = vld [vmem:[%s3676_s4 + $0x58] sm:$0xff]  ;;  %v341_v27 = vld [vmem:[%s3676_s4 + $0x20] sm:$0xff]  ;;  %v342_v28 = vld [vmem:[%s3676_s4 + $0x28] sm:$0xff]  ;;  %p2294_p4 = pnand %p2293_p3, %p2287_p0 }
  0x39   :  { %419 = vmatpush1.msra.mxu0 %v358_v35  ;;  %2141 = vmatpush3.msra.mxu1 %v360_v29  ;;  %v692_v47 = vadd.f32 1e-06, %v684_v42  ;;  %v344_v15 = vld [vmem:[%s3676_s4 + $0x38] sm:$0xff]  ;;  %v338_v32 = vld [vmem:[%s3676_s4 + $0x8] sm:$0xff]  ;;  %v339_v33 = vld [vmem:[%s3676_s4 + $0x10] sm:$0xff] }
  0x3a   :  { %2115 = vmatprep.mubr.f32.mxu1 %v2568_v0  ;;  %420 = vmatprep.subr.mxu0 %v356_v41  ;;  %v693_v51 = vadd.f32 1e-06, %v685_v45  ;;  %v352_v0 = vld [vmem:[%s3676_s4 + $0x78] sm:$0xff]  ;;  %v337_v35 = vld [vmem:[%s3676_s4] sm:$0xff]  ;;  %v2931_v41 = vld [vmem:[%s3680_s8 + $0x8] sm:$0x1f] }
  0x3b   :  { %2142 = vmatprep.subr.mxu1 %v357_v44  ;;  %213 = vmatprep.mubr.f32.mxu0 %v2308_v50  ;;  %2186 = vrcp.f32 %v692_v47  ;;  %v46_v40 = vld [vmem:[%s3674_s2] sm:$0xff]  ;;  %v48_v45 = vld [vmem:[%s3674_s2 + $0x10] sm:$0xff] }
  0x3c   :  { %2116 = vmatmul.mubr.f32.gmra.mxu1 %v2697_v39  ;;  %421 = vmatpush1.msra.mxu0 %v355_v46  ;;  %2188 = vrcp.f32 %v693_v51  ;;  %v351_v39 = vld [vmem:[%s3676_s4 + $0x70] sm:$0xff]  ;;  %v2936_v42 = vld [vmem:[%s3679_s7] sm:$0x1f]  ;;  %v49_v46 = vld [vmem:[%s3674_s2 + $0x18] sm:$0xff] }
  0x3d   :  { %2143 = vmatpush3.msra.mxu1 %v357_v44  ;;  %214 = vmatmul.mubr.f32.gmra.mxu0 %v43_v48  ;;  %v2941_v44 = vld [vmem:[%s3680_s8] sm:$0x1f]  ;;  %v52_v51 = vld [vmem:[%s3674_s2 + $0x30] sm:$0xff] }
  0x3e   :  { %v2818_v55 = vpop.eup %2174  ;;  %422 = vmatprep.subr.mxu0 %v353_v52  ;;  %2144 = vmatprep.subr.mxu1 %v354_v53  ;;  %v50_v47 = vld [vmem:[%s3674_s2 + $0x20] sm:$0xff]  ;;  %v53_v52 = vld [vmem:[%s3674_s2 + $0x38] sm:$0xff] }
  0x3f   :  { %v2823_v58 = vpop.eup %2176  ;;  %423 = vmatpush1.msra.mxu0 %v352_v0  ;;  %2145 = vmatpush3.msra.mxu1 %v354_v53  ;;  %v2830_v60 = vmul.f32 %v2818_v55, %v2580_v3  ;;  %v347_v3 = vld [vmem:[%s3676_s4 + $0x50] sm:$0xff]  ;;  %v710_v53 = vmul.f32 %v2818_v55, %v2563_v63 }
  0x40   :  { %v2832_v61 = vpop.eup %2178  ;;  %2118 = vmatprep.mubr.f32.mxu1 %v42_v21  ;;  %424 = vmatprep.subr.mxu0 %v350_v54  ;;  %v2839_v6 = vmul.f32 %v2823_v58, %v2607_v11  ;;  %v346_v11 = vld [vmem:[%s3676_s4 + $0x48] sm:$0xff]  ;;  %v343_v21 = vld [vmem:[%s3676_s4 + $0x30] sm:$0xff]  ;;  %v711_v0 = vmul.f32 %v2823_v58, %v2585_v4 }
  0x41   :  { %v2841_v7 = vpop.eup %2180  ;;  %2146 = vmatprep.subr.mxu1 %v351_v39  ;;  %219 = vmatprep.mubr.f32.mxu0 %v2308_v50  ;;  %v2852_v9 = vmul.f32 %v2832_v61, %v2631_v18  ;;  %v345_v18 = vld [vmem:[%s3676_s4 + $0x40] sm:$0xff]  ;;  %v712_v63 = vmul.f32 %v2832_v61, %v2612_v12 }
  0x42   :  { %2119 = vmatmul.mubr.f32.gmra.mxu1 %v43_v48  ;;  %425 = vmatpush1.msra.mxu0 %v349_v59  ;;  %v2859_v14 = vmul.f32 %v2841_v7, %v2650_v24  ;;  %v45_v24 = vld [vmem:[%s3673_s1 + $0x38] sm:$0xff]  ;;  %v51_v48 = vld [vmem:[%s3674_s2 + $0x28] sm:$0xff]  ;;  %v713_v4 = vmul.f32 %v2841_v7, %v2636_v19 }
  0x43   :  { %2147 = vmatpush3.msra.mxu1 %v351_v39  ;;  %220 = vmatmul.mubr.f32.gmra.mxu0 %v44_v5 }
  0x44   :  { %v2864_v16 = vpop.eup %2182  ;;  %426 = vmatprep.subr.mxu0 %v347_v3  ;;  %2148 = vmatprep.subr.mxu1 %v348_v8 }
  0x45   :  { %v2869_v20 = vpop.eup %2184  ;;  %427 = vmatpush1.msra.mxu0 %v346_v11  ;;  %2149 = vmatpush3.msra.mxu1 %v348_v8  ;;  %v2879_v22 = vmul.f32 %v2864_v16, %v2673_v31  ;;  %v340_v31 = vld [vmem:[%s3676_s4 + $0x18] sm:$0xff]  ;;  %v714_v12 = vmul.f32 %v2864_v16, %v2655_v25  ;;  %v104_v11 = vlaneseq }
  0x46   :  { %2121 = vmatprep.mubr.f32.mxu1 %v44_v5  ;;  %428 = vmatprep.subr.mxu0 %v344_v15  ;;  %v2883_v26 = vmul.f32 %v2869_v20, %v2704_v43  ;;  %v715_v19 = vmul.f32 %v2869_v20, %v2684_v36 }
  0x47   :  { %2150 = vmatprep.subr.mxu1 %v345_v18  ;;  %225 = vmatprep.mubr.f32.mxu0 %v2308_v50 }
  0x48   :  { %v2892_v29 = vpop.eup %2186  ;;  %2122 = vmatmul.mubr.f32.gmra.mxu1 %v45_v24  ;;  %429 = vmatpush1.msra.mxu0 %v343_v21  ;;  %v3172_v21 = vld [vmem:[%s3677_s5] sm:$0x7] }
  0x49   :  { %v2897_v43 = vpop.eup %2188  ;;  %2151 = vmatpush3.msra.mxu1 %v345_v18  ;;  %226 = vmatmul.mubr.f32.gmra.mxu0 %v45_v24  ;;  %v2907_v34 = vmul.f32 %v2892_v29, %v2733_v57  ;;  %v47_v57 = vld [vmem:[%s3674_s2 + $0x8] sm:$0xff]  ;;  %v716_v25 = vmul.f32 %v2892_v29, %v2716_v49  ;;  %v1018_v49 = vmul.f32 %v2818_v55, %v2575_v2 }
  0x4a   :  { %430 = vmatprep.subr.mxu0 %v341_v27  ;;  %2152 = vmatprep.subr.mxu1 %v342_v28  ;;  %v2914_v38 = vmul.f32 %v2897_v43, %v2763_v13  ;;  %v2926_v13 = vld [vmem:[%s3679_s7 + $0x8] sm:$0x1f]  ;;  %v717_v36 = vmul.f32 %v2897_v43, %v2744_v62  ;;  %v1019_v62 = vmul.f32 %v2823_v58, %v2602_v10  ;;  %v3181_v27 = vld [vmem:[%s3678_s6] sm:$0x7] }
  0x4b   :  { %431 = vmatpush1.msra.mxu0 %v340_v31  ;;  %2153 = vmatpush3.msra.mxu1 %v342_v28  ;;  %v1020_v2 = vmul.f32 %v2832_v61, %v2626_v17  ;;  %v1021_v10 = vmul.f32 %v2841_v7, %v2645_v23  ;;  %v1022_v17 = vmul.f32 %v2864_v16, %v2668_v30  ;;  %v3162_v16 = vshrl.u32 %v104_v11, 7 }
  0x4c   :  { %432 = vmatprep.subr.mxu0 %v338_v32  ;;  %2154 = vmatprep.subr.mxu1 %v339_v33  ;;  %v1023_v23 = vmul.f32 %v2869_v20, %v2689_v37  ;;  %v1024_v30 = vmul.f32 %v2892_v29, %v2728_v56  ;;  %v1025_v37 = vmul.f32 %v2897_v43, %v2749_v1 }
  0x4d   :  { %433 = vmatpush1.msra.mxu0 %v337_v35  ;;  %466 = vmatprep.mubr.f32.mxu0 %v2308_v50  ;;  %3692 = vst [vmem:[#allocation10_spill] sm:$0xff] %v3162_v16  ;;  %v106_v24 = vsub.s32 0, %v3162_v16  ;;  %3694 = vst [vmem:[#allocation12_spill] sm:$0xff] %v3172_v21  ;;  %v110_v28 = vsub.s32 1, %v3162_v16 }
  0x4e   :  { %2155 = vmatpush3.msra.mxu1 %v339_v33  ;;  %2156 = vmatprep.mubr.f32.mxu1 %v46_v40  ;;  %3696 = vst [vmem:[#allocation14_spill] sm:$0xff] %v3181_v27 }
  0x4f   :  { %467 = vmatmul.mubr.f32.vlgmr.msra.gmra.mxu0 %v46_v40  ;;  %2157 = vmatmul.mubr.f32.vlgmr.msra.gmra.mxu1 %v47_v57  ;;  %v3187_v31 = vrot.slane %v3172_v21, %v106_v24  ;;  %v3190_v43 = vrot.slane %v3181_v27, %v106_v24  ;;  %v3195_v33 = vrot.slane %v3172_v21, %v110_v28 }
  0x50   :  { %1923 = vmatprep.subr.msk.mxu1 %vm745_vm0, %v2926_v13  ;;  %1933 = vmatprep.subr.msk.mxu0 %vm745_vm0, %v2931_v41 }
  0x51   :  { %1924 = vmatpush1.msk.msra.mxu1 %vm745_vm0, %v2936_v42  ;;  %1934 = vmatpush1.msk.msra.mxu0 %vm745_vm0, %v2941_v44 }
  0x52   :  { %472 = vmatprep.mubr.f32.mxu0 %v2308_v50  ;;  %2159 = vmatprep.mubr.f32.mxu1 %v48_v45 }
  0x53   :  { %473 = vmatmul.mubr.f32.gmra.mxu0 %v47_v57  ;;  %2160 = vmatmul.mubr.f32.gmra.mxu1 %v49_v46 }
  0x54   :  { %478 = vmatprep.mubr.f32.mxu0 %v2308_v50  ;;  %2162 = vmatprep.mubr.f32.mxu1 %v50_v47 }
  0x55   :  { %2168 = vmatprep.subr.msk.mxu1 %vm745_vm0, %v2931_v41  ;;  %1953 = vmatprep.subr.msk.mxu0 %vm745_vm0, %v2931_v41 }
  0x57   :  { %479 = vmatmul.mubr.f32.gmra.mxu0 %v48_v45  ;;  %2163 = vmatmul.mubr.f32.gmra.mxu1 %v51_v48 }
  0x58   :  { %484 = vmatprep.mubr.f32.mxu0 %v2308_v50  ;;  %2165 = vmatprep.mubr.f32.mxu1 %v52_v51 }
  0x5b   :  { %485 = vmatmul.mubr.f32.gmra.mxu0 %v49_v46  ;;  %2166 = vmatmul.mubr.f32.gmra.mxu1 %v53_v52 }
  0x5c   :  { %490 = vmatprep.mubr.f32.mxu0 %v2308_v50  ;;  %816 = vmatprep.mubr.f32.mxu1 %v2308_v50 }
  0x5f   :  { %491 = vmatmul.mubr.f32.gmra.mxu0 %v50_v47  ;;  %1925 = vmatmul.mubr.msk.f32.vlgmr.msra.gmra.mxu1 %vm720_vm1, %v710_v53 }
  0x60   :  { %2169 = vmatpush1.msk.msra.mxu1 %vm745_vm0, %v2941_v44  ;;  %496 = vmatprep.mubr.f32.mxu0 %v2308_v50 }
  0x61   :  { %822 = vmatprep.mubr.f32.mxu1 %v2308_v50  ;;  %1943 = vmatprep.subr.msk.mxu1 %vm745_vm0, %v2926_v13 }
  0x63   :  { %497 = vmatmul.mubr.f32.gmra.mxu0 %v51_v48  ;;  %1926 = vmatmul.mubr.msk.f32.gmra.mxu1 %vm720_vm1, %v711_v0 }
  0x64   :  { %502 = vmatprep.mubr.f32.mxu0 %v2308_v50  ;;  %828 = vmatprep.mubr.f32.mxu1 %v2308_v50 }
  0x67   :  { %503 = vmatmul.mubr.f32.gmra.mxu0 %v52_v51  ;;  %1927 = vmatmul.mubr.msk.f32.gmra.mxu1 %vm720_vm1, %v712_v63 }
  0x68   :  { %508 = vmatprep.mubr.f32.mxu0 %v2308_v50  ;;  %834 = vmatprep.mubr.f32.mxu1 %v2308_v50 }
  0x6b   :  { %509 = vmatmul.mubr.f32.gmra.mxu0 %v53_v52  ;;  %1928 = vmatmul.mubr.msk.f32.gmra.mxu1 %vm720_vm1, %v713_v4 }
  0x6c   :  { %840 = vmatprep.mubr.f32.mxu1 %v2308_v50  ;;  %937 = vmatprep.mubr.f32.mxu0 %v2308_v50 }
  0x6f   :  { %1929 = vmatmul.mubr.msk.f32.gmra.mxu1 %vm720_vm1, %v714_v12  ;;  %1935 = vmatmul.mubr.msk.f32.vlgmr.msra.gmra.mxu0 %vm720_vm1, %v710_v53 }
  0x70   :  { %1954 = vmatpush1.msk.msra.mxu0 %vm745_vm0, %v2941_v44  ;;  %846 = vmatprep.mubr.f32.mxu1 %v2308_v50 }
  0x71   :  { %943 = vmatprep.mubr.f32.mxu0 %v2308_v50  ;;  %1973 = vmatprep.subr.msk.mxu0 %vm745_vm0, %v2931_v41 }
  0x73   :  { %1930 = vmatmul.mubr.msk.f32.gmra.mxu1 %vm720_vm1, %v715_v19  ;;  %1936 = vmatmul.mubr.msk.f32.gmra.mxu0 %vm720_vm1, %v711_v0 }
  0x74   :  { %852 = vmatprep.mubr.f32.mxu1 %v2308_v50  ;;  %949 = vmatprep.mubr.f32.mxu0 %v2308_v50 }
  0x77   :  { %1931 = vmatmul.mubr.msk.f32.gmra.mxu1 %vm720_vm1, %v716_v25  ;;  %1937 = vmatmul.mubr.msk.f32.gmra.mxu0 %vm720_vm1, %v712_v63 }
  0x78   :  { %858 = vmatprep.mubr.f32.mxu1 %v2308_v50  ;;  %955 = vmatprep.mubr.f32.mxu0 %v2308_v50 }
  0x7b   :  { %1932 = vmatmul.mubr.msk.f32.gmra.mxu1 %vm720_vm1, %v717_v36  ;;  %1938 = vmatmul.mubr.msk.f32.gmra.mxu0 %vm720_vm1, %v713_v4 }
  0x7c   :  { %961 = vmatprep.mubr.f32.mxu0 %v2308_v50  ;;  %973 = vmatprep.mubr.f32.mxu1 %v2308_v50 }
  0x7f   :  { %1939 = vmatmul.mubr.msk.f32.gmra.mxu0 %vm720_vm1, %v714_v12  ;;  %1941 = vmatmul.mubr.msk.f32.vlgmr.msra.gmra.mxu1 %vm720_vm1, %v716_v25 }
  0x80   :  { %1944 = vmatpush1.msk.msra.mxu1 %vm745_vm0, %v2936_v42  ;;  %967 = vmatprep.mubr.f32.mxu0 %v2308_v50 }
  0x81   :  { %979 = vmatprep.mubr.f32.mxu1 %v2308_v50  ;;  %1963 = vmatprep.subr.msk.mxu1 %vm745_vm0, %v2926_v13 }
  0x83   :  { %1940 = vmatmul.mubr.msk.f32.gmra.mxu0 %vm720_vm1, %v715_v19  ;;  %1942 = vmatmul.mubr.msk.f32.gmra.mxu1 %vm720_vm1, %v717_v36 }
  0x84   :  { %1114 = vmatprep.mubr.f32.mxu1 %v2308_v50  ;;  %1227 = vmatprep.mubr.f32.mxu0 %v2308_v50 }
  0x87   :  { %1945 = vmatmul.mubr.msk.f32.vlgmr.msra.gmra.mxu1 %vm720_vm1, %v1018_v49  ;;  %1955 = vmatmul.mubr.msk.f32.vlgmr.msra.gmra.mxu0 %vm720_vm1, %v1018_v49 }
  0x88   :  { %1964 = vmatpush1.msk.msra.mxu1 %vm745_vm0, %v2936_v42  ;;  %1974 = vmatpush1.msk.msra.mxu0 %vm745_vm0, %v2941_v44 }
  0x89   :  { %1120 = vmatprep.mubr.f32.mxu1 %v2308_v50  ;;  %1233 = vmatprep.mubr.f32.mxu0 %v2308_v50 }
  0x8b   :  { %1946 = vmatmul.mubr.msk.f32.gmra.mxu1 %vm720_vm1, %v1019_v62  ;;  %1956 = vmatmul.mubr.msk.f32.gmra.mxu0 %vm720_vm1, %v1019_v62 }
  0x8c   :  { %1126 = vmatprep.mubr.f32.mxu1 %v2308_v50  ;;  %1239 = vmatprep.mubr.f32.mxu0 %v2308_v50 }
  0x8f   :  { %1947 = vmatmul.mubr.msk.f32.gmra.mxu1 %vm720_vm1, %v1020_v2  ;;  %1957 = vmatmul.mubr.msk.f32.gmra.mxu0 %vm720_vm1, %v1020_v2 }
  0x90   :  { %1132 = vmatprep.mubr.f32.mxu1 %v2308_v50  ;;  %1245 = vmatprep.mubr.f32.mxu0 %v2308_v50 }
  0x93   :  { %1948 = vmatmul.mubr.msk.f32.gmra.mxu1 %vm720_vm1, %v1021_v10  ;;  %1958 = vmatmul.mubr.msk.f32.gmra.mxu0 %vm720_vm1, %v1021_v10 }
  0x94   :  { %1138 = vmatprep.mubr.f32.mxu1 %v2308_v50  ;;  %1251 = vmatprep.mubr.f32.mxu0 %v2308_v50 }
  0x97   :  { %1949 = vmatmul.mubr.msk.f32.gmra.mxu1 %vm720_vm1, %v1022_v17  ;;  %1959 = vmatmul.mubr.msk.f32.gmra.mxu0 %vm720_vm1, %v1022_v17 }
  0x98   :  { %1144 = vmatprep.mubr.f32.mxu1 %v2308_v50  ;;  %1257 = vmatprep.mubr.f32.mxu0 %v2308_v50 }
  0x9b   :  { %1950 = vmatmul.mubr.msk.f32.gmra.mxu1 %vm720_vm1, %v1023_v23  ;;  %1960 = vmatmul.mubr.msk.f32.gmra.mxu0 %vm720_vm1, %v1023_v23 }
  0x9c   :  { %1150 = vmatprep.mubr.f32.mxu1 %v2308_v50  ;;  %1263 = vmatprep.mubr.f32.mxu0 %v2308_v50 }
  0x9f   :  { %1951 = vmatmul.mubr.msk.f32.gmra.mxu1 %vm720_vm1, %v1024_v30  ;;  %1961 = vmatmul.mubr.msk.f32.gmra.mxu0 %vm720_vm1, %v1024_v30 }
  0xa0   :  { %1156 = vmatprep.mubr.f32.mxu1 %v2308_v50  ;;  %1269 = vmatprep.mubr.f32.mxu0 %v2308_v50 }
  0xa3   :  { %1952 = vmatmul.mubr.msk.f32.gmra.mxu1 %vm720_vm1, %v1025_v37  ;;  %1962 = vmatmul.mubr.msk.f32.gmra.mxu0 %vm720_vm1, %v1025_v37 }
  0xa4   :  { %1404 = vmatprep.mubr.f32.mxu1 %v2308_v50  ;;  %1517 = vmatprep.mubr.f32.mxu0 %v2308_v50 }
  0xa7   :  { %1965 = vmatmul.mubr.msk.f32.vlgmr.msra.gmra.mxu1 %vm720_vm1, %v2830_v60  ;;  %1975 = vmatmul.mubr.msk.f32.vlgmr.msra.gmra.mxu0 %vm720_vm1, %v2830_v60 }
  0xa8   :  { %1410 = vmatprep.mubr.f32.mxu1 %v2308_v50  ;;  %1523 = vmatprep.mubr.f32.mxu0 %v2308_v50 }
  0xab   :  { %1966 = vmatmul.mubr.msk.f32.gmra.mxu1 %vm720_vm1, %v2839_v6  ;;  %1976 = vmatmul.mubr.msk.f32.gmra.mxu0 %vm720_vm1, %v2839_v6 }
  0xac   :  { %1416 = vmatprep.mubr.f32.mxu1 %v2308_v50  ;;  %1529 = vmatprep.mubr.f32.mxu0 %v2308_v50 }
  0xaf   :  { %1967 = vmatmul.mubr.msk.f32.gmra.mxu1 %vm720_vm1, %v2852_v9  ;;  %1977 = vmatmul.mubr.msk.f32.gmra.mxu0 %vm720_vm1, %v2852_v9 }
  0xb0   :  { %1422 = vmatprep.mubr.f32.mxu1 %v2308_v50  ;;  %1535 = vmatprep.mubr.f32.mxu0 %v2308_v50 }
  0xb3   :  { %1968 = vmatmul.mubr.msk.f32.gmra.mxu1 %vm720_vm1, %v2859_v14  ;;  %1978 = vmatmul.mubr.msk.f32.gmra.mxu0 %vm720_vm1, %v2859_v14 }
  0xb4   :  { %1428 = vmatprep.mubr.f32.mxu1 %v2308_v50  ;;  %1541 = vmatprep.mubr.f32.mxu0 %v2308_v50 }
  0xb7   :  { %1969 = vmatmul.mubr.msk.f32.gmra.mxu1 %vm720_vm1, %v2879_v22  ;;  %1979 = vmatmul.mubr.msk.f32.gmra.mxu0 %vm720_vm1, %v2879_v22 }
  0xb8   :  { %1434 = vmatprep.mubr.f32.mxu1 %v2308_v50  ;;  %1547 = vmatprep.mubr.f32.mxu0 %v2308_v50 }
  0xbb   :  { %1970 = vmatmul.mubr.msk.f32.gmra.mxu1 %vm720_vm1, %v2883_v26  ;;  %1980 = vmatmul.mubr.msk.f32.gmra.mxu0 %vm720_vm1, %v2883_v26 }
  0xbc   :  { %1440 = vmatprep.mubr.f32.mxu1 %v2308_v50  ;;  %1553 = vmatprep.mubr.f32.mxu0 %v2308_v50 }
  0xbf   :  { %1971 = vmatmul.mubr.msk.f32.gmra.mxu1 %vm720_vm1, %v2907_v34  ;;  %1981 = vmatmul.mubr.msk.f32.gmra.mxu0 %vm720_vm1, %v2907_v34  ;;  %v3198_v34 = vrot.slane %v3181_v27, %v110_v28 }
  0xc0   :  { %1446 = vmatprep.mubr.f32.mxu1 %v2308_v50  ;;  %1559 = vmatprep.mubr.f32.mxu0 %v2308_v50 }
  0xc3   :  { %1972 = vmatmul.mubr.msk.f32.gmra.mxu1 %vm720_vm1, %v2914_v38  ;;  %1982 = vmatmul.mubr.msk.f32.gmra.mxu0 %vm720_vm1, %v2914_v38 }
  0xe2   :  { %v185_v56 = vpop.f32.mrf.mxu0 }
  0xe3   :  { %v3142_v61 = vpop.f32.mrf.mxu1  ;;  %v186_v40 = vadd.f32 %v185_v56, %v3187_v31 }
  0xe4   :  { %v187_v1 = vpop.f32.mrf.mxu0  ;;  %3687 = vst [vmem:[#allocation5_spill] sm:$0xff] %v3142_v61 }
  0xe5   :  { %v3148_v6 = vpop.f32.mrf.mxu1  ;;  %v188_v42 = vadd.f32 %v187_v1, %v3195_v33 }
  0xe6   :  { %3688 = vst [vmem:[#allocation6_spill] sm:$0xff] %v3148_v6 }
  0xe8   :  { %v191_v54 = vpop.f32.mrf.mxu0 }
  0xe9   :  { %v192_v48 = vadd.f32 %v191_v54, %v3187_v31 }
  0xea   :  { %v193_v55 = vpop.f32.mrf.mxu0 }
  0xeb   :  { %v194_v63 = vadd.f32 %v193_v55, %v3195_v33 }
  0xed   :  { %v197_v39 = vpop.f32.mrf.mxu0 }
  0xee   :  { %v198_v36 = vadd.f32 %v197_v39, %v3187_v31 }
  0xef   :  { %v199_v58 = vpop.f32.mrf.mxu0 }
  0xf0   :  { %v200_v17 = vadd.f32 %v199_v58, %v3195_v33 }
  0xf2   :  { %v203_v59 = vpop.f32.mrf.mxu0 }
  0xf3   :  { %v204_v1 = vadd.f32 %v203_v59, %v3187_v31 }
  0xf4   :  { %v3140_v60 = vpop.f32.mrf.mxu0 }
  0xf5   :  { %v206_v24 = vadd.f32 %v3140_v60, %v3195_v33 }
  0xf7   :  { %v3144_v5 = vpop.f32.mrf.mxu0 }
  0xf8   :  { %v210_v59 = vadd.f32 %v3144_v5, %v3187_v31 }
  0xf9   :  { %v3146_v50 = vpop.f32.mrf.mxu0 }
  0xfc   :  { %v3150_v7 = vpop.f32.mrf.mxu1 }
  0xfd   :  { %3689 = vst [vmem:[#allocation7_spill] sm:$0xff] %v3150_v7  ;;  %v3152_v3 = vpop.f32.mrf.mxu0 }
  0xfe   :  { %v3154_v8 = vpop.f32.mrf.mxu1 }
  0xff   :  { %3690 = vst [vmem:[#allocation8_spill] sm:$0xff] %v3154_v8  ;;  %v3156_v9 = vpop.f32.mrf.mxu0 }
 0x102   :  { %v3158_v14 = vpop.f32.mrf.mxu1 }
 0x103   :  { %3691 = vst [vmem:[#allocation9_spill] sm:$0xff] %v3158_v14  ;;  %v3160_v15 = vpop.f32.mrf.mxu0 }
 0x104   :  { %v3164_v18 = vpop.f32.mrf.mxu1 }
 0x105   :  { %3693 = vst [vmem:[#allocation11_spill] sm:$0xff] %v3164_v18  ;;  %v3166_v20 = vpop.f32.mrf.mxu0 }
 0x108   :  { %v3174_v22 = vpop.f32.mrf.mxu1 }
 0x109   :  { %3695 = vst [vmem:[#allocation13_spill] sm:$0xff] %v3174_v22  ;;  %v3176_v26 = vpop.f32.mrf.mxu0 }
 0x10a   :  { %v3192_v32 = vpop.f32.mrf.mxu1 }
 0x10b   :  { %v3184_v29 = vpop.f32.mrf.mxu0  ;;  %3697 = vst [vmem:[#allocation15_spill] sm:$0xff] %v3192_v32 }
 0x10f   :  { %v468_v35 = vpop.f32.mrf.mxu0  ;;  %v3200_v38 = vpop.f32.mrf.mxu1 }
 0x110   :  { %3698 = vst [vmem:[#allocation16_spill] sm:$0xff] %v3200_v38  ;;  %v469_v57 = vadd.f32 %v468_v35, %v3190_v43 }
 0x111   :  { %v470_v13 = vpop.f32.mrf.mxu0  ;;  %v3204_v41 = vpop.f32.mrf.mxu1 }
 0x112   :  { %3699 = vst [vmem:[#allocation17_spill] sm:$0xff] %v3204_v41  ;;  %v3207_v44 = vadd.f32 %v469_v57, %v186_v40  ;;  %v471_v45 = vadd.f32 %v470_v13, %v3198_v34 }
 0x113   :  { %v474_v46 = vpop.f32.mrf.mxu0  ;;  %v3210_v47 = vpop.f32.mrf.mxu1 }
 0x114   :  { %3700 = vst [vmem:[#allocation18_spill] sm:$0xff] %v3210_v47  ;;  %v3213_v51 = vadd.f32 %v471_v45, %v188_v42  ;;  %v475_v52 = vadd.f32 %v474_v46, %v3190_v43  ;;  %v212_v46 = vadd.f32 %v3146_v50, %v3195_v33 }
 0x115   :  { %v476_v53 = vpop.f32.mrf.mxu0  ;;  %v3216_v0 = vpop.f32.mrf.mxu1 }
 0x116   :  { %3701 = vst [vmem:[#allocation19_spill] sm:$0xff] %v3216_v0  ;;  %v3219_v4 = vadd.f32 %v475_v52, %v192_v48  ;;  %v477_v12 = vadd.f32 %v476_v53, %v3198_v34 }
 0x117   :  { %v480_v19 = vpop.f32.mrf.mxu0  ;;  %v3222_v25 = vpop.f32.mrf.mxu1 }
 0x118   :  { %3702 = vst [vmem:[#allocation20_spill] sm:$0xff] %v3222_v25  ;;  %v3225_v49 = vadd.f32 %v477_v12, %v194_v63  ;;  %v481_v62 = vadd.f32 %v480_v19, %v3190_v43  ;;  %v216_v63 = vadd.f32 %v3152_v3, %v3187_v31 }
 0x119   :  { %v482_v2 = vpop.f32.mrf.mxu0  ;;  %v3228_v10 = vpop.f32.mrf.mxu1 }
 0x11a   :  { %3703 = vst [vmem:[#allocation21_spill] sm:$0xff] %v3228_v10  ;;  %v3231_v23 = vadd.f32 %v481_v62, %v198_v36  ;;  %v483_v30 = vadd.f32 %v482_v2, %v3198_v34  ;;  %v218_v62 = vadd.f32 %v3156_v9, %v3195_v33 }
 0x11b   :  { %v486_v37 = vpop.f32.mrf.mxu0  ;;  %v3234_v56 = vpop.f32.mrf.mxu1 }
 0x11c   :  { %3704 = vst [vmem:[#allocation22_spill] sm:$0xff] %v3234_v56  ;;  %v3237_v54 = vadd.f32 %v483_v30, %v200_v17  ;;  %v487_v55 = vadd.f32 %v486_v37, %v3190_v43  ;;  %v222_v37 = vadd.f32 %v3160_v15, %v3187_v31 }
 0x11d   :  { %v488_v39 = vpop.f32.mrf.mxu0  ;;  %v3240_v11 = vpop.f32.mrf.mxu1 }
 0x11e   :  { %3705 = vst [vmem:[#allocation23_spill] sm:$0xff] %v3240_v11  ;;  %v3244_v58 = vadd.f32 %v487_v55, %v204_v1  ;;  %v489_v28 = vadd.f32 %v488_v39, %v3198_v34 }
 0x11f   :  { %v492_v35 = vpop.f32.mrf.mxu0  ;;  %v3247_v40 = vpop.f32.mrf.mxu1 }
 0x120   :  { %v3251_v57 = vadd.f32 %v489_v28, %v206_v24  ;;  %v493_v13 = vadd.f32 %v492_v35, %v3190_v43  ;;  %v224_v24 = vadd.f32 %v3166_v20, %v3195_v33 }
 0x121   :  { %v494_v42 = vpop.f32.mrf.mxu0  ;;  %v820_v45 = vpop.f32.mrf.mxu1 }
 0x122   :  { %3706 = vst [vmem:[#allocation24_spill] sm:$0xff] %v3251_v57  ;;  %v3256_v60 = vadd.f32 %v493_v13, %v210_v59  ;;  %v495_v48 = vadd.f32 %v494_v42, %v3198_v34  ;;  %v228_v13 = vadd.f32 %v3176_v26, %v3187_v31 }
 0x123   :  { %v498_v52 = vpop.f32.mrf.mxu0  ;;  %v3259_v53 = vpop.f32.mrf.mxu1 }
 0x124   :  { %3707 = vst [vmem:[#allocation25_spill] sm:$0xff] %v3256_v60  ;;  %v3263_v5 = vadd.f32 %v495_v48, %v212_v46  ;;  %v499_v12 = vadd.f32 %v498_v52, %v3190_v43  ;;  %v230_v52 = vadd.f32 %v3184_v29, %v3195_v33 }
 0x125   :  { %v500_v19 = vpop.f32.mrf.mxu0  ;;  %v826_v36 = vpop.f32.mrf.mxu1 }
 0x126   :  { %3708 = vst [vmem:[#allocation26_spill] sm:$0xff] %v3263_v5  ;;  %v3268_v50 = vadd.f32 %v499_v12, %v216_v63  ;;  %v501_v2 = vadd.f32 %v500_v19, %v3198_v34 }
 0x127   :  { %v504_v17 = vpop.f32.mrf.mxu0  ;;  %v3271_v30 = vpop.f32.mrf.mxu1 }
 0x128   :  { %3709 = vst [vmem:[#allocation27_spill] sm:$0xff] %v3268_v50  ;;  %v3275_v3 = vadd.f32 %v501_v2, %v218_v62  ;;  %v505_v1 = vadd.f32 %v504_v17, %v3190_v43 }
 0x129   :  { %v506_v55 = vpop.f32.mrf.mxu0  ;;  %v832_v39 = vpop.f32.mrf.mxu1 }
 0x12a   :  { %3710 = vst [vmem:[#allocation28_spill] sm:$0xff] %v3275_v3  ;;  %v3280_v9 = vadd.f32 %v505_v1, %v222_v37  ;;  %v507_v28 = vadd.f32 %v506_v55, %v3198_v34 }
 0x12b   :  { %v510_v35 = vpop.f32.mrf.mxu0  ;;  %v3283_v59 = vpop.f32.mrf.mxu1 }
 0x12c   :  { %3711 = vst [vmem:[#allocation29_spill] sm:$0xff] %v3280_v9  ;;  %v3287_v15 = vadd.f32 %v507_v28, %v224_v24  ;;  %v511_v42 = vadd.f32 %v510_v35, %v3190_v43 }
 0x12d   :  { %v512_v46 = vpop.f32.mrf.mxu0  ;;  %v838_v48 = vpop.f32.mrf.mxu1 }
 0x12e   :  { %3712 = vst [vmem:[#allocation30_spill] sm:$0xff] %v3287_v15  ;;  %v3292_v20 = vadd.f32 %v511_v42, %v228_v13  ;;  %v513_v63 = vadd.f32 %v512_v46, %v3198_v34 }
 0x12f   :  { %v3295_v12 = vpop.f32.mrf.mxu1  ;;  %v3297_v19 = vpop.f32.mrf.mxu0 }
 0x130   :  { %3713 = vst [vmem:[#allocation31_spill] sm:$0xff] %v3292_v20  ;;  %v3299_v62 = vadd.f32 %v513_v63, %v230_v52  ;;  %v986_v50 = vmul.f32 %v3297_v19, %v3247_v40 }
 0x131   :  { %v844_v26 = vpop.f32.mrf.mxu1  ;;  %v941_v31 = vpop.f32.mrf.mxu0 }
 0x132   :  { %3714 = vst [vmem:[#allocation32_spill] sm:$0xff] %v3299_v62  ;;  %v3301_v2 = vmul.f32 %v941_v31, %v820_v45 }
 0x133   :  { %v3303_v43 = vpop.f32.mrf.mxu1  ;;  %v3305_v17 = vpop.f32.mrf.mxu0 }
 0x135   :  { %v850_v37 = vpop.f32.mrf.mxu1  ;;  %v947_v29 = vpop.f32.mrf.mxu0 }
 0x136   :  { %v3307_v33 = vmul.f32 %v947_v29, %v826_v36 }
 0x137   :  { %v3309_v1 = vpop.f32.mrf.mxu1  ;;  %v3311_v34 = vpop.f32.mrf.mxu0 }
 0x139   :  { %v856_v55 = vpop.f32.mrf.mxu1  ;;  %v953_v24 = vpop.f32.mrf.mxu0 }
 0x13a   :  { %v3313_v28 = vmul.f32 %v953_v24, %v832_v39 }
 0x13b   :  { %v3315_v35 = vpop.f32.mrf.mxu1  ;;  %v3317_v45 = vpop.f32.mrf.mxu0 }
 0x13c   :  { %3715 = vst [vmem:[#allocation33_spill] sm:$0xff] %v3315_v35 }
 0x13d   :  { %v862_v13 = vpop.f32.mrf.mxu1  ;;  %v959_v42 = vpop.f32.mrf.mxu0 }
 0x13e   :  { %v3319_v46 = vmul.f32 %v959_v42, %v838_v48 }
 0x13f   :  { %v3321_v52 = vpop.f32.mrf.mxu0  ;;  %v3323_v36 = vpop.f32.mrf.mxu1 }
 0x141   :  { %v965_v63 = vpop.f32.mrf.mxu0  ;;  %v977_v31 = vpop.f32.mrf.mxu1 }
 0x142   :  { %v3325_v29 = vmul.f32 %v965_v63, %v844_v26  ;;  %v3327_v22 = vmul.f32 %v977_v31, %v856_v55 }
 0x143   :  { %v3329_v39 = vpop.f32.mrf.mxu0  ;;  %v3331_v24 = vpop.f32.mrf.mxu1 }
 0x144   :  { %3716 = vst [vmem:[#allocation34_spill] sm:$0xff] %v3325_v29  ;;  %3717 = vst [vmem:[#allocation35_spill] sm:$0xff] %v3327_v22 }
 0x145   :  { %3718 = vst [vmem:[#allocation36_spill] sm:$0xff] %v3331_v24  ;;  %v971_v56 = vpop.f32.mrf.mxu0  ;;  %v983_v32 = vpop.f32.mrf.mxu1 }
 0x146   :  { %v3333_v11 = vmul.f32 %v971_v56, %v850_v37  ;;  %v3335_v48 = vmul.f32 %v983_v32, %v862_v13 }
 0x147   :  { %v1116_v42 = vpop.f32.mrf.mxu1  ;;  %v1229_v14 = vpop.f32.mrf.mxu0 }
 0x148   :  { %3719 = vst [vmem:[#allocation37_spill] sm:$0xff] %v3333_v11  ;;  %3720 = vst [vmem:[#allocation38_spill] sm:$0xff] %v3335_v48  ;;  %v1276_v22 = vmul.f32 %v1229_v14, %v1116_v42 }
 0x149   :  { %v1118_v25 = vpop.f32.mrf.mxu1  ;;  %v1231_v18 = vpop.f32.mrf.mxu0 }
 0x14a   :  { %v1277_v5 = vmul.f32 %v1231_v18, %v1118_v25  ;;  %v1292_v29 = vadd.f32 %v1276_v22, %v986_v50 }
 0x14b   :  { %v1122_v10 = vpop.f32.mrf.mxu1  ;;  %v1235_v7 = vpop.f32.mrf.mxu0 }
 0x14c   :  { %v1278_v57 = vmul.f32 %v1235_v7, %v1122_v10  ;;  %v1293_v14 = vadd.f32 %v1277_v5, %v3301_v2 }
 0x14d   :  { %v1124_v26 = vpop.f32.mrf.mxu1  ;;  %v1237_v63 = vpop.f32.mrf.mxu0 }
 0x14f   :  { %v1128_v55 = vpop.f32.mrf.mxu1  ;;  %v1241_v31 = vpop.f32.mrf.mxu0 }
 0x150   :  { %v1280_v22 = vmul.f32 %v1241_v31, %v1128_v55 }
 0x151   :  { %v1130_v47 = vpop.f32.mrf.mxu1  ;;  %v1243_v8 = vpop.f32.mrf.mxu0 }
 0x152   :  { %v1281_v10 = vmul.f32 %v1243_v8, %v1130_v47  ;;  %v992_v8 = vmul.f32 %v3317_v45, %v3283_v59 }
 0x153   :  { %v1134_v0 = vpop.f32.mrf.mxu1  ;;  %v1247_v61 = vpop.f32.mrf.mxu0 }
 0x154   :  { %v1297_v2 = vadd.f32 %v1281_v10, %v3313_v28  ;;  %v994_v28 = vmul.f32 %v3321_v52, %v3295_v12 }
 0x155   :  { %v1136_v38 = vpop.f32.mrf.mxu1  ;;  %v1249_v6 = vpop.f32.mrf.mxu0 }
 0x157   :  { %v3337_v56 = vpop.f32.mrf.mxu1  ;;  %v3339_v32 = vpop.f32.mrf.mxu0 }
 0x159   :  { %v3341_v37 = vpop.f32.mrf.mxu1  ;;  %v3343_v13 = vpop.f32.mrf.mxu0 }
 0x15b   :  { %v3345_v41 = vpop.f32.mrf.mxu1  ;;  %v3347_v62 = vpop.f32.mrf.mxu0 }
 0x15c   :  { %v1286_v12 = vmul.f32 %v3347_v62, %v3345_v41  ;;  %v3733_v62 = vld [vmem:[#allocation24_spill] sm:$0xff] }
 0x15d   :  { %v3349_v27 = vpop.f32.mrf.mxu1  ;;  %v3351_v21 = vpop.f32.mrf.mxu0 }
 0x15e   :  { %3721 = vst [vmem:[#allocation39_spill] sm:$0xff] %v3351_v21 }
 0x15f   :  { %v3353_v20 = vpop.f32.mrf.mxu1  ;;  %v3355_v15 = vpop.f32.mrf.mxu0 }
 0x160   :  { %3722 = vst [vmem:[#allocation40_spill] sm:$0xff] %v3353_v20  ;;  %3723 = vst [vmem:[#allocation41_spill] sm:$0xff] %v3355_v15  ;;  %v1279_v15 = vmul.f32 %v1237_v63, %v1124_v26 }
 0x161   :  { %v3357_v48 = vpop.f32.mrf.mxu1  ;;  %v3359_v16 = vpop.f32.mrf.mxu0 }
 0x162   :  { %3724 = vst [vmem:[#allocation42_spill] sm:$0xff] %v3357_v48  ;;  %3725 = vst [vmem:[#allocation43_spill] sm:$0xff] %v3359_v16  ;;  %v1295_v7 = vadd.f32 %v1279_v15, %v3307_v33  ;;  %v1283_v33 = vmul.f32 %v1249_v6, %v1136_v38 }
 0x163   :  { %v3361_v9 = vpop.f32.mrf.mxu1  ;;  %v3363_v3 = vpop.f32.mrf.mxu0 }
 0x164   :  { %3726 = vst [vmem:[#allocation44_spill] sm:$0xff] %v3361_v9  ;;  %3727 = vst [vmem:[#allocation45_spill] sm:$0xff] %v3363_v3  ;;  %v988_v3 = vmul.f32 %v3305_v17, %v3259_v53 }
 0x165   :  { %v3365_v24 = vpop.f32.mrf.mxu1  ;;  %v3367_v35 = vpop.f32.mrf.mxu0 }
 0x166   :  { %3728 = vst [vmem:[#allocation46_spill] sm:$0xff] %v3365_v24  ;;  %3729 = vst [vmem:[#allocation47_spill] sm:$0xff] %v3367_v35  ;;  %v1294_v21 = vadd.f32 %v1278_v57, %v988_v3 }
 0x167   :  { %v1406_v11 = vpop.f32.mrf.mxu1  ;;  %v1519_v60 = vpop.f32.mrf.mxu0  ;;  %v3732_v10 = vld [vmem:[#allocation41_spill] sm:$0xff] }
 0x168   :  { %v1566_v48 = vmul.f32 %v1519_v60, %v1406_v11 }
 0x169   :  { %v1408_v16 = vpop.f32.mrf.mxu1  ;;  %v1521_v20 = vpop.f32.mrf.mxu0 }
 0x16a   :  { %v1582_v42 = vadd.f32 %v1566_v48, %v1292_v29  ;;  %v1567_v24 = vmul.f32 %v1521_v20, %v1408_v16  ;;  %v990_v16 = vmul.f32 %v3311_v34, %v3271_v30  ;;  %v1282_v20 = vmul.f32 %v1247_v61, %v1134_v0 }
 0x16b   :  { %v1412_v35 = vpop.f32.mrf.mxu1  ;;  %v1525_v9 = vpop.f32.mrf.mxu0  ;;  %v1284_v30 = vmul.f32 %v3339_v32, %v3337_v56  ;;  %v1285_v56 = vmul.f32 %v3343_v13, %v3341_v37 }
 0x16c   :  { %v1614_v18 = vadd.f32 %v3207_v44, %v1582_v42  ;;  %v1583_v25 = vadd.f32 %v1567_v24, %v1293_v14  ;;  %v1568_v40 = vmul.f32 %v1525_v9, %v1412_v35  ;;  %v1296_v47 = vadd.f32 %v1280_v22, %v990_v16  ;;  %v3731_v22 = vld [vmem:[#allocation40_spill] sm:$0xff] }
 0x16d   :  { %v1414_v11 = vpop.f32.mrf.mxu1  ;;  %v1527_v60 = vpop.f32.mrf.mxu0  ;;  %v1298_v24 = vadd.f32 %v1282_v20, %v992_v8  ;;  %v1300_v31 = vadd.f32 %v1284_v30, %v994_v28 }
 0x16e   :  { %v1983_v50 = vmul.f32 -1.442695, %v1614_v18  ;;  %v1615_v53 = vadd.f32 %v3213_v51, %v1583_v25  ;;  %v1584_v19 = vadd.f32 %v1568_v40, %v1294_v21  ;;  %v1569_v5 = vmul.f32 %v1527_v60, %v1414_v11  ;;  %v3730_v40 = vld [vmem:[#allocation39_spill] sm:$0xff] }
 0x16f   :  { %v1418_v57 = vpop.f32.mrf.mxu1  ;;  %v1531_v3 = vpop.f32.mrf.mxu0  ;;  %v1287_v37 = vmul.f32 %v3730_v40, %v3349_v27  ;;  %v1288_v11 = vmul.f32 %v3732_v10, %v3731_v22  ;;  %v3735_v27 = vld [vmem:[#allocation25_spill] sm:$0xff] }
 0x170   :  { %2190 = vpow2.f32 %v1983_v50  ;;  %v1984_v44 = vmul.f32 -1.442695, %v1615_v53  ;;  %v1616_v9 = vadd.f32 %v3219_v4, %v1584_v19  ;;  %v1585_v15 = vadd.f32 %v1569_v5, %v1295_v7  ;;  %v3734_v50 = vld [vmem:[#allocation34_spill] sm:$0xff]  ;;  %v3749_v10 = vld [vmem:[#allocation29_spill] sm:$0xff] }
 0x171   :  { %v1570_v51 = vmul.f32 %v1531_v3, %v1418_v57  ;;  %v1420_v21 = vpop.f32.mrf.mxu1  ;;  %v1533_v17 = vpop.f32.mrf.mxu0  ;;  %v1301_v53 = vadd.f32 %v1285_v56, %v3734_v50  ;;  %v3736_v57 = vld [vmem:[#allocation37_spill] sm:$0xff]  ;;  %v3751_v50 = vld [vmem:[#allocation38_spill] sm:$0xff] }
 0x172   :  { %v1985_v35 = vmul.f32 -1.442695, %v1616_v9  ;;  %v1617_v61 = vadd.f32 %v3225_v49, %v1585_v15  ;;  %v1571_v0 = vmul.f32 %v1533_v17, %v1420_v21  ;;  %2192 = vpow2.f32 %v1984_v44  ;;  %v3737_v21 = vld [vmem:[#allocation42_spill] sm:$0xff]  ;;  %v3738_v17 = vld [vmem:[#allocation43_spill] sm:$0xff] }
 0x173   :  { %v1586_v4 = vadd.f32 %v1570_v51, %v1296_v47  ;;  %v1424_v34 = vpop.f32.mrf.mxu1  ;;  %v1537_v29 = vpop.f32.mrf.mxu0  ;;  %v1299_v49 = vadd.f32 %v1283_v33, %v3319_v46  ;;  %v996_v46 = vmul.f32 %v3329_v39, %v3303_v43  ;;  %v1303_v3 = vadd.f32 %v1287_v37, %v3736_v57 }
 0x174   :  { %2194 = vpow2.f32 %v1985_v35  ;;  %v1587_v59 = vadd.f32 %v1571_v0, %v1297_v2  ;;  %v1572_v45 = vmul.f32 %v1537_v29, %v1424_v34  ;;  %v1986_v32 = vmul.f32 -1.442695, %v1617_v61  ;;  %v3739_v35 = vld [vmem:[#allocation26_spill] sm:$0xff]  ;;  %v3740_v29 = vld [vmem:[#allocation44_spill] sm:$0xff] }
 0x175   :  { %v1618_v6 = vadd.f32 %v3231_v23, %v1586_v4  ;;  %v1426_v38 = vpop.f32.mrf.mxu1  ;;  %v1539_v48 = vpop.f32.mrf.mxu0  ;;  %v1302_v39 = vadd.f32 %v1286_v12, %v996_v46  ;;  %v1289_v33 = vmul.f32 %v3738_v17, %v3737_v21  ;;  %v3748_v46 = vld [vmem:[#allocation28_spill] sm:$0xff] }
 0x176   :  { %v1619_v26 = vadd.f32 %v3237_v54, %v1587_v59  ;;  %v1588_v63 = vadd.f32 %v1572_v45, %v1298_v24  ;;  %v1573_v55 = vmul.f32 %v1539_v48, %v1426_v38  ;;  %v998_v54 = vmul.f32 %v3323_v36, %v3309_v1  ;;  %v3741_v24 = vld [vmem:[#allocation45_spill] sm:$0xff]  ;;  %v3742_v45 = vld [vmem:[#allocation27_spill] sm:$0xff] }
 0x177   :  { %v1987_v14 = vmul.f32 -1.442695, %v1618_v6  ;;  %v1430_v42 = vpop.f32.mrf.mxu1  ;;  %v1543_v18 = vpop.f32.mrf.mxu0  ;;  %v1290_v59 = vmul.f32 %v3741_v24, %v3740_v29  ;;  %v3743_v48 = vld [vmem:[#allocation33_spill] sm:$0xff] }
 0x178   :  { %v1620_v23 = vadd.f32 %v3244_v58, %v1588_v63  ;;  %v1589_v52 = vadd.f32 %v1573_v55, %v1299_v49  ;;  %v1574_v25 = vmul.f32 %v1543_v18, %v1430_v42  ;;  %v1988_v1 = vmul.f32 -1.442695, %v1619_v26  ;;  %v3744_v49 = vld [vmem:[#allocation36_spill] sm:$0xff]  ;;  %v3745_v63 = vld [vmem:[#allocation46_spill] sm:$0xff]  ;;  %v3746_v55 = vld [vmem:[#allocation47_spill] sm:$0xff] }
 0x179   :  { %2196 = vpow2.f32 %v1987_v14  ;;  %v1432_v13 = vpop.f32.mrf.mxu1  ;;  %v1545_v7 = vpop.f32.mrf.mxu0  ;;  %v1304_v8 = vadd.f32 %v1288_v11, %v998_v54  ;;  %v1000_v26 = vmul.f32 %v3744_v49, %v3743_v48  ;;  %v3759_v49 = vld [vmem:[#allocation16_spill] sm:$0xff] }
 0x17a   :  { %v1989_v41 = vmul.f32 -1.442695, %v1620_v23  ;;  %v1621_v58 = vadd.f32 %v3733_v62, %v1589_v52  ;;  %v1590_v60 = vadd.f32 %v1574_v25, %v1300_v31  ;;  %2198 = vpow2.f32 %v1986_v32  ;;  %v3747_v52 = vld [vmem:[#allocation35_spill] sm:$0xff]  ;;  %v3750_v62 = vld [vmem:[#allocation10_spill] sm:$0xff] }
 0x17b   :  { %v1575_v36 = vmul.f32 %v1545_v7, %v1432_v13  ;;  %v1436_v19 = vpop.f32.mrf.mxu1  ;;  %v1549_v43 = vpop.f32.mrf.mxu0  ;;  %v1291_v31 = vmul.f32 %v3746_v55, %v3745_v63  ;;  %v1305_v25 = vadd.f32 %v1289_v33, %v3747_v52  ;;  %v1306_v22 = vadd.f32 %v1290_v59, %v1000_v26 }
 0x17c   :  { %2200 = vpow2.f32 %v1989_v41  ;;  %v1622_v5 = vadd.f32 %v3735_v27, %v1590_v60  ;;  %v1576_v16 = vmul.f32 %v1549_v43, %v1436_v19  ;;  %v1990_v18 = vmul.f32 -1.442695, %v1621_v58 }
 0x17d   :  { %v2191_v20 = vpop.eup %2190  ;;  %v1591_v44 = vadd.f32 %v1575_v36, %v1301_v53  ;;  %v1438_v9 = vpop.f32.mrf.mxu1  ;;  %2202 = vpow2.f32 %v1988_v1  ;;  %v114_v60 = vsub.s32 2, %v3750_v62  ;;  %v1307_v53 = vadd.f32 %v1291_v31, %v3751_v50  ;;  %v3763_v62 = vld [vmem:[#allocation18_spill] sm:$0xff] }
 0x17e   :  { %v1551_v15 = vpop.f32.mrf.mxu0  ;;  %v1678_v47 = vadd.f32 1.0, %v2191_v20  ;;  %v1991_v2 = vmul.f32 -1.442695, %v1622_v5  ;;  %v1592_v51 = vadd.f32 %v1576_v16, %v1302_v39  ;;  %v3752_v20 = vld [vmem:[#allocation30_spill] sm:$0xff] }
 0x17f   :  { %v1623_v61 = vadd.f32 %v3739_v35, %v1591_v44  ;;  %v1577_v0 = vmul.f32 %v1551_v15, %v1438_v9  ;;  %v1442_v30 = vpop.f32.mrf.mxu1  ;;  %v2193_v34 = vpop.eup %2192  ;;  %v3753_v44 = vld [vmem:[#allocation31_spill] sm:$0xff] }
 0x180   :  { %v1555_v4 = vpop.f32.mrf.mxu0  ;;  %2204 = vrcp.f32 %v1678_v47  ;;  %v1624_v28 = vadd.f32 %v3742_v45, %v1592_v51  ;;  %v1679_v54 = vadd.f32 1.0, %v2193_v34  ;;  %v3754_v47 = vld [vmem:[#allocation12_spill] sm:$0xff]  ;;  %v3755_v51 = vld [vmem:[#allocation14_spill] sm:$0xff]  ;;  %v3757_v34 = vld [vmem:[#allocation17_spill] sm:$0xff] }
 0x181   :  { %v1578_v6 = vmul.f32 %v1555_v4, %v1442_v30  ;;  %v2195_v38 = vpop.eup %2194  ;;  %2206 = vpow2.f32 %v1991_v2  ;;  %v1593_v56 = vadd.f32 %v1577_v0, %v1303_v3  ;;  %v1444_v32 = vpop.f32.mrf.mxu1  ;;  %v1992_v16 = vmul.f32 -1.442695, %v1623_v61  ;;  %v3756_v0 = vld [vmem:[#allocation32_spill] sm:$0xff] }
 0x182   :  { %v1557_v14 = vpop.f32.mrf.mxu0  ;;  %v1680_v42 = vadd.f32 1.0, %v2195_v38  ;;  %v1993_v12 = vmul.f32 -1.442695, %v1624_v28  ;;  %v3426_v2 = vrot.slane %v3754_v47, %v114_v60  ;;  %v3429_v21 = vrot.slane %v3755_v51, %v114_v60  ;;  %v3758_v28 = vld [vmem:[#allocation6_spill] sm:$0xff]  ;;  %v3766_v51 = vld [vmem:[#allocation11_spill] sm:$0xff] }
 0x183   :  { %v1594_v23 = vadd.f32 %v1578_v6, %v1304_v8  ;;  %v1625_v40 = vadd.f32 %v3748_v46, %v1593_v56  ;;  %v1579_v37 = vmul.f32 %v1557_v14, %v1444_v32  ;;  %v1448_v13 = vpop.f32.mrf.mxu1  ;;  %v3760_v32 = vld [vmem:[#allocation5_spill] sm:$0xff]  ;;  %v3761_v46 = vld [vmem:[#allocation19_spill] sm:$0xff] }
 0x184   :  { %v1561_v7 = vpop.f32.mrf.mxu0  ;;  %2208 = vrcp.f32 %v1680_v42  ;;  %v582_v29 = vadd.f32 %v3757_v34, %v3429_v21  ;;  %v299_v6 = vadd.f32 %v3758_v28, %v3426_v2  ;;  %v587_v26 = vadd.f32 %v3759_v49, %v3429_v21  ;;  %v3767_v34 = vld [vmem:[#allocation20_spill] sm:$0xff] }
 0x185   :  { %v1626_v11 = vadd.f32 %v3749_v10, %v1594_v23  ;;  %v1580_v41 = vmul.f32 %v1561_v7, %v1448_v13  ;;  %2210 = vpow2.f32 %v1993_v12  ;;  %v1595_v58 = vadd.f32 %v1579_v37, %v1305_v25  ;;  %v1450_v1 = vpop.f32.mrf.mxu1 }
 0x186   :  { %v1563_v36 = vpop.f32.mrf.mxu0  ;;  %v2197_v19 = vpop.eup %2196  ;;  %2212 = vpow2.f32 %v1990_v18  ;;  %v1994_v33 = vmul.f32 -1.442695, %v1625_v40  ;;  %v304_v14 = vadd.f32 %v3760_v32, %v3426_v2  ;;  %v592_v40 = vadd.f32 %v3761_v46, %v3429_v21 }
 0x187   :  { %v1995_v43 = vmul.f32 -1.442695, %v1626_v11  ;;  %v1596_v39 = vadd.f32 %v1580_v41, %v1306_v22  ;;  %v1581_v27 = vmul.f32 %v1563_v36, %v1450_v1  ;;  %2214 = vrcp.f32 %v1679_v54  ;;  %v2199_v3 = vpop.eup %2198  ;;  %v3762_v22 = vld [vmem:[#allocation8_spill] sm:$0xff]  ;;  %v3764_v1 = vld [vmem:[#allocation7_spill] sm:$0xff] }
 0x188   :  { %v1682_v5 = vadd.f32 1.0, %v2197_v19  ;;  %v1627_v57 = vadd.f32 %v3752_v20, %v1595_v58  ;;  %v1681_v30 = vadd.f32 1.0, %v2199_v3  ;;  %v309_v10 = vadd.f32 %v3762_v22, %v3426_v2  ;;  %v3771_v22 = vld [vmem:[#allocation22_spill] sm:$0xff] }
 0x189   :  { %2216 = vpow2.f32 %v1995_v43  ;;  %v1628_v9 = vadd.f32 %v3753_v44, %v1596_v39  ;;  %v1597_v15 = vadd.f32 %v1581_v27, %v1307_v53  ;;  %v2201_v8 = vpop.eup %2200  ;;  %v597_v60 = vadd.f32 %v3763_v62, %v3429_v21  ;;  %v3453_v44 = vld [vmem:[%s3681_s9] ss:$0 sm:$0xff] }
 0x18a   :  { %2218 = vrcp.f32 %v1682_v5  ;;  %v1684_v17 = vadd.f32 1.0, %v2201_v8  ;;  %v2203_v4 = vpop.eup %2202  ;;  %v1996_v24 = vmul.f32 -1.442695, %v1627_v57  ;;  %v314_v36 = vadd.f32 %v3764_v1, %v3426_v2  ;;  %v3765_v57 = vld [vmem:[#allocation21_spill] sm:$0xff] }
 0x18b   :  { %v1997_v35 = vmul.f32 -1.442695, %v1628_v9  ;;  %v1629_v61 = vadd.f32 %v3756_v0, %v1597_v15  ;;  %2220 = vpow2.f32 %v1992_v16  ;;  %v1683_v63 = vadd.f32 1.0, %v2203_v4  ;;  %v3772_v1 = vld [vmem:[#allocation13_spill] sm:$0xff] }
 0x18c   :  { %2222 = vrcp.f32 %v1684_v17  ;;  %v602_v3 = vadd.f32 %v3765_v57, %v3429_v21  ;;  %v319_v17 = vadd.f32 %v3766_v51, %v3426_v2 }
 0x18d   :  { %v2205_v59 = vpop.eup %2204  ;;  %2224 = vpow2.f32 %v1997_v35  ;;  %v1998_v23 = vmul.f32 -1.442695, %v1629_v61  ;;  %v2270_v35 = vld [vmem:[%s3674_s2] sm:$0xff] }
 0x18e   :  { %v2207_v45 = vpop.eup %2206  ;;  %2226 = vpow2.f32 %v1994_v33  ;;  %v1726_v38 = vmul.f32 %v2205_v59, %v582_v29  ;;  %v607_v29 = vadd.f32 %v3767_v34, %v3429_v21 }
 0x18f   :  { %2228 = vrcp.f32 %v1681_v30  ;;  %v1686_v48 = vadd.f32 1.0, %v2207_v45 }
 0x190   :  { %2230 = vpow2.f32 %v1996_v24  ;;  %v1734_v55 = vadd.f32 %v1726_v38, %v299_v6 }
 0x191   :  { %v2209_v31 = vpop.eup %2208  ;;  %2232 = vrcp.f32 %v1686_v48  ;;  %v3768_v48 = vld [vmem:[#allocation9_spill] sm:$0xff] }
 0x192   :  { %v2211_v56 = vpop.eup %2210  ;;  %2234 = vtanh.f32 %v1734_v55  ;;  %v1727_v42 = vmul.f32 %v2209_v31, %v587_v26  ;;  %v324_v49 = vadd.f32 %v3768_v48, %v3426_v2  ;;  %v3769_v55 = vld [vmem:[#allocation23_spill] sm:$0xff] }
 0x193   :  { %v2213_v18 = vpop.eup %2212  ;;  %v1688_v12 = vadd.f32 1.0, %v2211_v56  ;;  %2236 = vrcp.f32 %v1683_v63  ;;  %v612_v31 = vadd.f32 %v3769_v55, %v3429_v21  ;;  %v2271_v56 = vld [vmem:[%s3674_s2 + $0x8] sm:$0xff]  ;;  %v2277_v55 = vld [vmem:[%s3674_s2 + $0x38] sm:$0xff] }
 0x194   :  { %v2215_v52 = vpop.eup %2214  ;;  %v1735_v25 = vadd.f32 %v1727_v42, %v304_v14  ;;  %v1685_v13 = vadd.f32 1.0, %v2213_v18 }
 0x195   :  { %2238 = vrcp.f32 %v1688_v12  ;;  %v1847_v15 = vsub.f32 1.0, %v2215_v52  ;;  %v1863_v0 = vmul.f32 %v2270_v35, %v2215_v52 }
 0x196   :  { %v2217_v54 = vpop.eup %2216  ;;  %2240 = vtanh.f32 %v1735_v25 }
 0x197   :  { %v2219_v37 = vpop.eup %2218  ;;  %v1690_v7 = vadd.f32 1.0, %v2217_v54  ;;  %2242 = vpow2.f32 %v1998_v23  ;;  %v3770_v23 = vld [vmem:[#allocation15_spill] sm:$0xff] }
 0x198   :  { %v1728_v11 = vmul.f32 %v2219_v37, %v592_v40  ;;  %v2221_v41 = vpop.eup %2220  ;;  %v329_v52 = vadd.f32 %v3770_v23, %v3426_v2 }
 0x199   :  { %2244 = vrcp.f32 %v1690_v7  ;;  %v2223_v50 = vpop.eup %2222  ;;  %v1687_v39 = vadd.f32 1.0, %v2221_v41 }
 0x19a   :  { %v1736_v53 = vadd.f32 %v1728_v11, %v309_v10  ;;  %v2225_v58 = vpop.eup %2224  ;;  %2246 = vrcp.f32 %v1685_v13  ;;  %v1729_v19 = vmul.f32 %v2223_v50, %v597_v60  ;;  %v617_v10 = vadd.f32 %v3771_v22, %v3429_v21  ;;  %v2272_v11 = vld [vmem:[%s3674_s2 + $0x10] sm:$0xff]  ;;  %v2273_v21 = vld [vmem:[%s3674_s2 + $0x18] sm:$0xff] }
 0x19b   :  { %v2227_v43 = vpop.eup %2226  ;;  %v1692_v27 = vadd.f32 1.0, %v2225_v58 }
 0x19c   :  { %v2229_v5 = vpop.eup %2228  ;;  %2248 = vtanh.f32 %v1736_v53  ;;  %v1737_v16 = vadd.f32 %v1729_v19, %v314_v36  ;;  %v1689_v8 = vadd.f32 1.0, %v2227_v43  ;;  %v334_v36 = vadd.f32 %v3772_v1, %v3426_v2 }
 0x19d   :  { %v2231_v20 = vpop.eup %2230  ;;  %2250 = vrcp.f32 %v1692_v27  ;;  %v1848_v45 = vsub.f32 1.0, %v2229_v5  ;;  %v1864_v32 = vmul.f32 %v2271_v56, %v2229_v5 }
 0x19e   :  { %v2233_v9 = vpop.eup %2232  ;;  %2252 = vtanh.f32 %v1737_v16  ;;  %v1691_v28 = vadd.f32 1.0, %v2231_v20 }
 0x19f   :  { %v2235_v47 = vpop.eup %2234  ;;  %2254 = vrcp.f32 %v1687_v39  ;;  %v1730_v33 = vmul.f32 %v2233_v9, %v602_v3 }
 0x1a0   :  { %v1757_v61 = vmul.f32 %v2235_v47, %v3453_v44  ;;  %v1855_v30 = vmul.f32 %v2235_v47, %v1847_v15  ;;  %v2237_v4 = vpop.eup %2236  ;;  %2256 = vrcp.f32 %v1689_v8  ;;  %v2274_v15 = vld [vmem:[%s3674_s2 + $0x20] sm:$0xff] }
 0x1a1   :  { %v1738_v24 = vadd.f32 %v1730_v33, %v319_v17  ;;  %v1849_v37 = vsub.f32 1.0, %v2237_v4  ;;  %v1865_v41 = vmul.f32 %v2272_v11, %v2237_v4 }
 0x1a2   :  { %v2239_v59 = vpop.eup %2238  ;;  %v1871_v6 = vadd.f32 %v1863_v0, %v1855_v30  ;;  %1765 = vadd.xlane.f32.xlu0 %v1757_v61  ;;  %v2275_v61 = vld [vmem:[%s3674_s2 + $0x28] sm:$0xff] }
 0x1a3   :  { %v2241_v38 = vpop.eup %2240  ;;  %2258 = vtanh.f32 %v1738_v24  ;;  %v1731_v26 = vmul.f32 %v2239_v59, %v607_v29 }
 0x1a4   :  { %v2243_v63 = vpop.eup %2242  ;;  %1879 = vst [vmem:[#allocation2] sm:$0xff] %v1871_v6  ;;  %v1758_v14 = vmul.f32 %v2241_v38, %v3453_v44  ;;  %v1856_v42 = vmul.f32 %v2241_v38, %v1848_v45  ;;  %2260 = vrcp.f32 %v1691_v28  ;;  %v2276_v28 = vld [vmem:[%s3674_s2 + $0x30] sm:$0xff] }
 0x1a5   :  { %v1739_v12 = vadd.f32 %v1731_v26, %v324_v49  ;;  %v1693_v40 = vadd.f32 1.0, %v2243_v63 }
 0x1a6   :  { %v2245_v18 = vpop.eup %2244  ;;  %v1872_v25 = vadd.f32 %v1864_v32, %v1856_v42  ;;  %1767 = vadd.xlane.f32.xlu0 %v1758_v14 }
 0x1a7   :  { %v1732_v54 = vmul.f32 %v2245_v18, %v612_v31  ;;  %v2247_v46 = vpop.eup %2246  ;;  %2262 = vtanh.f32 %v1739_v12 }
 0x1a8   :  { %1880 = vst [vmem:[#allocation2 + $0x8] sm:$0xff] %v1872_v25  ;;  %v1850_v60 = vsub.f32 1.0, %v2247_v46  ;;  %v1866_v39 = vmul.f32 %v2273_v21, %v2247_v46 }
 0x1a9   :  { %v1740_v13 = vadd.f32 %v1732_v54, %v329_v52  ;;  %v2249_v7 = vpop.eup %2248 }
 0x1aa   :  { %v2251_v62 = vpop.eup %2250  ;;  %v1759_v50 = vmul.f32 %v2249_v7, %v3453_v44  ;;  %v1857_v53 = vmul.f32 %v2249_v7, %v1849_v37 }
 0x1ab   :  { %2264 = vtanh.f32 %v1740_v13  ;;  %v2253_v58 = vpop.eup %2252  ;;  %v1733_v19 = vmul.f32 %v2251_v62, %v617_v10 }
 0x1ac   :  { %2266 = vrcp.f32 %v1693_v40  ;;  %v2255_v43 = vpop.eup %2254  ;;  %v1873_v27 = vadd.f32 %v1865_v41, %v1857_v53  ;;  %1769 = vadd.xlane.f32.xlu1 %v1759_v50  ;;  %v1760_v5 = vmul.f32 %v2253_v58, %v3453_v44  ;;  %v1858_v16 = vmul.f32 %v2253_v58, %v1850_v60 }
 0x1ad   :  { %v1741_v20 = vadd.f32 %v1733_v19, %v334_v36  ;;  %v2257_v3 = vpop.eup %2256  ;;  %v1851_v9 = vsub.f32 1.0, %v2255_v43  ;;  %v1867_v8 = vmul.f32 %v2274_v15, %v2255_v43 }
 0x1ae   :  { %1881 = vst [vmem:[#allocation2 + $0x10] sm:$0xff] %v1873_v27  ;;  %v1874_v57 = vadd.f32 %v1866_v39, %v1858_v16  ;;  %v1852_v33 = vsub.f32 1.0, %v2257_v3  ;;  %v1868_v30 = vmul.f32 %v2275_v61, %v2257_v3 }
 0x1af   :  { %2268 = vtanh.f32 %v1741_v20 }
 0x1b0   :  { %v2259_v2 = vpop.eup %2258  ;;  %1882 = vst [vmem:[#allocation2 + $0x18] sm:$0xff] %v1874_v57  ;;  %1771 = vadd.xlane.f32.xlu1 %v1760_v5 }
 0x1b1   :  { %v1761_v47 = vmul.f32 %v2259_v2, %v3453_v44  ;;  %v1859_v51 = vmul.f32 %v2259_v2, %v1851_v9  ;;  %v2261_v17 = vpop.eup %2260 }
 0x1b2   :  { %v1853_v29 = vsub.f32 1.0, %v2261_v17  ;;  %v1869_v6 = vmul.f32 %v2276_v28, %v2261_v17 }
 0x1b3   :  { %v1875_v35 = vadd.f32 %v1867_v8, %v1859_v51  ;;  %1773 = vadd.xlane.f32.xlu0 %v1761_v47 }
 0x1b4   :  { %v2263_v0 = vpop.eup %2262 }
 0x1b5   :  { %1883 = vst [vmem:[#allocation2 + $0x20] sm:$0xff] %v1875_v35  ;;  %v1762_v4 = vmul.f32 %v2263_v0, %v3453_v44  ;;  %v1860_v34 = vmul.f32 %v2263_v0, %v1852_v33 }
 0x1b7   :  { %v1876_v59 = vadd.f32 %v1868_v30, %v1860_v34  ;;  %1775 = vadd.xlane.f32.xlu1 %v1762_v4 }
 0x1b8   :  { %v2265_v24 = vpop.eup %2264 }
 0x1b9   :  { %v2267_v45 = vpop.eup %2266  ;;  %v1763_v38 = vmul.f32 %v2265_v24, %v3453_v44  ;;  %v1861_v48 = vmul.f32 %v2265_v24, %v1853_v29  ;;  %1884 = vst [vmem:[#allocation2 + $0x28] sm:$0xff] %v1876_v59 }
 0x1ba   :  { %v1854_v26 = vsub.f32 1.0, %v2267_v45  ;;  %v1870_v31 = vmul.f32 %v2277_v55, %v2267_v45 }
 0x1bb   :  { %v1877_v49 = vadd.f32 %v1869_v6, %v1861_v48  ;;  %1777 = vadd.xlane.f32.xlu0 %v1763_v38 }
 0x1bc   :  { %v2269_v63 = vpop.eup %2268 }
 0x1bd   :  { %1885 = vst [vmem:[#allocation2 + $0x30] sm:$0xff] %v1877_v49  ;;  %v1764_v56 = vmul.f32 %v2269_v63, %v3453_v44  ;;  %v1862_v32 = vmul.f32 %v2269_v63, %v1854_v26 }
 0x1bf   :  { %v1878_v14 = vadd.f32 %v1870_v31, %v1862_v32  ;;  %1779 = vadd.xlane.f32.xlu1 %v1764_v56 }
 0x1c1   :  { %1886 = vst [vmem:[#allocation2 + $0x38] sm:$0xff] %v1878_v14 }
 0x1c2   :  { %2297 = shalt.err (!%p2294_p4)
}
 0x1c3   :  { %s2310_s15 = smov 128   ;;  %s2311_s16 = smov 8   ;;  %v2000_v44 = vld [vmem:[%s3672_s0 + $0x40] sm:$0xff]  ;;  %v2001_v54 = vld [vmem:[%s3672_s0 + $0x48] sm:$0xff]  ;;  %v2002_v10 = vld [vmem:[%s3672_s0 + $0x50] sm:$0xff] }
 0x1c4   :  { %1900 = dma.vmem_to_hbm [thread:$0]  %s1895_s13, 1024, %s3683_s11, [#allocation3], %s2310_s15, %s2310_s15, %s2311_s16  }
 0x1c5   :  { %v2016_v42 = vld [vmem:[%s3672_s0 + $0x80] sm:$0xff]  ;;  %v2017_v46 = vld [vmem:[%s3672_s0 + $0x88] sm:$0xff]  ;;  %v2018_v11 = vld [vmem:[%s3672_s0 + $0x90] sm:$0xff] }
 0x1c6   :  { %v2278_v12 = vld [vmem:[%s3672_s0] sm:$0xff]  ;;  %v2279_v37 = vld [vmem:[%s3672_s0 + $0x8] sm:$0xff]  ;;  %v2280_v62 = vld [vmem:[%s3672_s0 + $0x10] sm:$0xff] }
 0x1c7   :  { %v2003_v58 = vld [vmem:[%s3672_s0 + $0x58] sm:$0xff]  ;;  %v2004_v27 = vld [vmem:[%s3672_s0 + $0x60] sm:$0xff]  ;;  %v2005_v2 = vld [vmem:[%s3672_s0 + $0x68] sm:$0xff] }
 0x1c8   :  { %v2019_v1 = vld [vmem:[%s3672_s0 + $0x98] sm:$0xff]  ;;  %v2020_v5 = vld [vmem:[%s3672_s0 + $0xa0] sm:$0xff]  ;;  %v2021_v15 = vld [vmem:[%s3672_s0 + $0xa8] sm:$0xff] }
 0x1c9   :  { %v2281_v19 = vld [vmem:[%s3672_s0 + $0x18] sm:$0xff]  ;;  %v2282_v20 = vld [vmem:[%s3672_s0 + $0x20] sm:$0xff]  ;;  %v2283_v47 = vld [vmem:[%s3672_s0 + $0x28] sm:$0xff] }
 0x1ca   :  { %v2006_v35 = vld [vmem:[%s3672_s0 + $0x70] sm:$0xff]  ;;  %v2007_v24 = vld [vmem:[%s3672_s0 + $0x78] sm:$0xff] }
 0x1cb   :  { %v2022_v0 = vld [vmem:[%s3672_s0 + $0xb0] sm:$0xff]  ;;  %v2023_v59 = vld [vmem:[%s3672_s0 + $0xb8] sm:$0xff] }
 0x1cc   :  { %v2284_v30 = vld [vmem:[%s3672_s0 + $0x30] sm:$0xff]  ;;  %v2285_v28 = vld [vmem:[%s3672_s0 + $0x38] sm:$0xff] }
 0x22b   :  { %v1766_v18 = vpop.xlane.xlu0 %1765 }
 0x22c   :  { %v1781_v23 = vmul.f32 %v2278_v12, %v1766_v18  ;;  %v1805_v52 = vmul.f32 %v2000_v44, %v1766_v18  ;;  %v1830_v25 = vmul.f32 %v2016_v42, %v1766_v18 }
 0x22e   :  { %1789 = vst.msk [vmem:[%s3682_s10] sm:$0xff] %vm720_vm1, %v1781_v23  ;;  %2008 = vst.msk [vmem:[%s3682_s10 + $0x40] sm:$0xff] %vm720_vm1, %v1805_v52 }
 0x22f   :  { %2024 = vst.msk [vmem:[%s3682_s10 + $0x80] sm:$0xff] %vm720_vm1, %v1830_v25  ;;  %v1768_v40 = vpop.xlane.xlu0 %1767 }
 0x230   :  { %v1782_v13 = vmul.f32 %v2279_v37, %v1768_v40  ;;  %v1806_v7 = vmul.f32 %v2001_v54, %v1768_v40  ;;  %v1831_v22 = vmul.f32 %v2017_v46, %v1768_v40 }
 0x232   :  { %1790 = vst.msk [vmem:[%s3682_s10 + $0x8] sm:$0xff] %vm720_vm1, %v1782_v13  ;;  %2009 = vst.msk [vmem:[%s3682_s10 + $0x48] sm:$0xff] %vm720_vm1, %v1806_v7 }
 0x233   :  { %2025 = vst.msk [vmem:[%s3682_s10 + $0x88] sm:$0xff] %vm720_vm1, %v1831_v22 }
 0x235   :  { %v1770_v41 = vpop.xlane.xlu1 %1769 }
 0x236   :  { %v1783_v60 = vmul.f32 %v2280_v62, %v1770_v41  ;;  %v1807_v50 = vmul.f32 %v2002_v10, %v1770_v41  ;;  %v1832_v53 = vmul.f32 %v2018_v11, %v1770_v41 }
 0x238   :  { %1791 = vst.msk [vmem:[%s3682_s10 + $0x10] sm:$0xff] %vm720_vm1, %v1783_v60  ;;  %2010 = vst.msk [vmem:[%s3682_s10 + $0x50] sm:$0xff] %vm720_vm1, %v1807_v50 }
 0x239   :  { %2026 = vst.msk [vmem:[%s3682_s10 + $0x90] sm:$0xff] %vm720_vm1, %v1832_v53  ;;  %v1772_v36 = vpop.xlane.xlu1 %1771 }
 0x23a   :  { %v1784_v43 = vmul.f32 %v2281_v19, %v1772_v36  ;;  %v1808_v21 = vmul.f32 %v2003_v58, %v1772_v36  ;;  %v1833_v39 = vmul.f32 %v2019_v1, %v1772_v36 }
 0x23c   :  { %1792 = vst.msk [vmem:[%s3682_s10 + $0x18] sm:$0xff] %vm720_vm1, %v1784_v43  ;;  %2011 = vst.msk [vmem:[%s3682_s10 + $0x58] sm:$0xff] %vm720_vm1, %v1808_v21  ;;  %v1774_v16 = vpop.xlane.xlu0 %1773 }
 0x23d   :  { %2027 = vst.msk [vmem:[%s3682_s10 + $0x98] sm:$0xff] %vm720_vm1, %v1833_v39  ;;  %v1785_v57 = vmul.f32 %v2282_v20, %v1774_v16  ;;  %v1809_v3 = vmul.f32 %v2004_v27, %v1774_v16  ;;  %v1834_v9 = vmul.f32 %v2020_v5, %v1774_v16 }
 0x23f   :  { %1793 = vst.msk [vmem:[%s3682_s10 + $0x20] sm:$0xff] %vm720_vm1, %v1785_v57  ;;  %2012 = vst.msk [vmem:[%s3682_s10 + $0x60] sm:$0xff] %vm720_vm1, %v1809_v3 }
 0x240   :  { %2028 = vst.msk [vmem:[%s3682_s10 + $0xa0] sm:$0xff] %vm720_vm1, %v1834_v9  ;;  %v1776_v8 = vpop.xlane.xlu1 %1775 }
 0x241   :  { %v1786_v51 = vmul.f32 %v2283_v47, %v1776_v8  ;;  %v1810_v17 = vmul.f32 %v2005_v2, %v1776_v8  ;;  %v1835_v33 = vmul.f32 %v2021_v15, %v1776_v8 }
 0x243   :  { %1794 = vst.msk [vmem:[%s3682_s10 + $0x28] sm:$0xff] %vm720_vm1, %v1786_v51  ;;  %2013 = vst.msk [vmem:[%s3682_s10 + $0x68] sm:$0xff] %vm720_vm1, %v1810_v17 }
 0x244   :  { %2029 = vst.msk [vmem:[%s3682_s10 + $0xa8] sm:$0xff] %vm720_vm1, %v1835_v33  ;;  %v1778_v61 = vpop.xlane.xlu0 %1777 }
 0x245   :  { %v1787_v4 = vmul.f32 %v2284_v30, %v1778_v61  ;;  %v1811_v34 = vmul.f32 %v2006_v35, %v1778_v61  ;;  %v1836_v29 = vmul.f32 %v2022_v0, %v1778_v61 }
 0x247   :  { %1795 = vst.msk [vmem:[%s3682_s10 + $0x30] sm:$0xff] %vm720_vm1, %v1787_v4  ;;  %2014 = vst.msk [vmem:[%s3682_s10 + $0x70] sm:$0xff] %vm720_vm1, %v1811_v34 }
 0x248   :  { %2030 = vst.msk [vmem:[%s3682_s10 + $0xb0] sm:$0xff] %vm720_vm1, %v1836_v29  ;;  %v1780_v45 = vpop.xlane.xlu1 %1779 }
 0x249   :  { %v1788_v6 = vmul.f32 %v2285_v28, %v1780_v45  ;;  %v1812_v38 = vmul.f32 %v2007_v24, %v1780_v45  ;;  %v1837_v48 = vmul.f32 %v2023_v59, %v1780_v45 }
 0x24b   :  { %1796 = vst.msk [vmem:[%s3682_s10 + $0x38] sm:$0xff] %vm720_vm1, %v1788_v6  ;;  %2015 = vst.msk [vmem:[%s3682_s10 + $0x78] sm:$0xff] %vm720_vm1, %v1812_v38 }
 0x24c   :  { %2031 = vst.msk [vmem:[%s3682_s10 + $0xb8] sm:$0xff] %vm720_vm1, %v1837_v48 }
 0x24d   :  { %2306 = dma.done.wait [#allocation3], 1024  }
 0x24e   :  { %2307 = vsyncadd [#allocation3], 4294966272 }
 0x24f   :  { %1906 = vsyncpa [#allocation3], 1 }

</bundles_post_ra>
